<compile_context>
chip_gen: v7x
topology: tpu7x:2x2x1
jax: 0.10.0
libtpu: 0.0.40
codegen_flags: <defaults>
</compile_context>

<pallas_src>
import functools

import jax
import jax.numpy as jnp
from jax import lax
from jax.experimental import pallas as pl
from jax.experimental.pallas import tpu as pltpu


def _round_up(v, m):
    return (v + m - 1) // m * m


def _plain_cnn_kernel(x_ref, wt_ref, bc_ref, w2_ref, bl_ref, o_ref,
                      *, ksize, width, hw, n_oc):
    """Fused conv3x3(valid)+bias+ReLU -> linear+bias+ReLU for one batch element.

    x_ref : [CP, HWP]      flattened image, zero-padded channels & tail
    wt_ref: [K*K, OC, CP]  conv weights per tap, pre-scaled by 1/255
    bc_ref: [OC, 1]        conv bias
    w2_ref: [OC, HW, NP]   linear weight permuted to (oc, oh*W+ow, n); zero at
                           invalid spatial positions and padded hidden columns
    bl_ref: [1, NP]        linear bias (zero padded)
    o_ref : [1, NP]        output row for this batch element
    """
    xb = x_ref[...]                                        # [CP, HWP] f32
    bcv = bc_ref[...]                                      # [OC, 1]  (hoisted)
    blv = bl_ref[...]                                      # [1, NP]  (hoisted)

    # ---- conv: 9 shifted-slice matmuls into a lane-dense [OC, HW] accumulator.
    # Accumulator starts from the (broadcast) conv bias -> saves one VPU add.
    acc = jnp.zeros((n_oc, hw), jnp.float32) + bcv
    for kh in range(ksize):
        for kw in range(ksize):
            off = kh * width + kw
            xs = xb[:, off:off + hw]                       # [CP, HW] static slice
            acc = acc + jnp.dot(wt_ref[kh * ksize + kw], xs,
                                preferred_element_type=jnp.float32)
    y = jnp.maximum(acc, 0.0)                              # ReLU, stays in VMEM

    # ---- linear: accumulate over conv channels, contraction on the lane axis.
    # Accumulator starts from the linear bias row.
    acc2 = jnp.zeros_like(blv) + blv                       # [1, NP]
    for c in range(n_oc):
        acc2 = acc2 + jnp.dot(y[c:c + 1, :], w2_ref[c],
                              preferred_element_type=jnp.float32)
    o_ref[...] = jnp.maximum(acc2, 0.0)


def plain_cnn_forward(x, params, *, kernel_size=3, stride=1):
    """PlainCNN forward. x: [B, C, H, W] raw pixel values (float)."""
    assert stride == 1, "module default stride=1"
    wc, bc, wl, bl = params["wc"], params["bc"], params["wl"], params["bl"]
    B, C, H, W = x.shape
    OC, C2, KH, KW = wc.shape
    K = kernel_size
    assert C == C2 and KH == KW == K
    OH, OW = H - K + 1, W - K + 1
    hidden = wl.shape[0]
    assert wl.shape == (hidden, OC * OH * OW)

    HW = H * W
    CP = _round_up(C, 8)                                   # padded input channels
    NP = _round_up(hidden, 128)                            # padded output lanes
    HWP = _round_up(HW + (K - 1) * W + (K - 1), 128)       # room for tap shifts

    f32 = jnp.float32
    # ---- parameter prep (fused under jit; scaling & flatten order folded) ----
    wtaps = jnp.transpose(wc.astype(f32) * (1.0 / 255.0), (2, 3, 0, 1))
    wtaps = jnp.pad(wtaps, ((0, 0), (0, 0), (0, 0), (0, CP - C)))
    wtaps = wtaps.reshape(K * K, OC, CP)
    bc2 = bc.astype(f32).reshape(OC, 1)
    # Linear weight reordered to consume the conv activation at q = oh*W + ow,
    # zeroed at invalid positions => no runtime mask / transpose needed.
    w2 = jnp.transpose(wl.astype(f32).reshape(hidden, OC, OH, OW), (1, 2, 3, 0))
    w2 = jnp.pad(w2, ((0, 0), (0, H - OH), (0, W - OW), (0, NP - hidden)))
    w2 = w2.reshape(OC, HW, NP)
    bl2 = jnp.pad(bl.astype(f32), (0, NP - hidden)).reshape(1, NP)
    # Image flattened per channel with zero tail so every tap shift stays in range.
    x_flat = jnp.pad(x.astype(f32).reshape(B, C, HW),
                     ((0, 0), (0, CP - C), (0, HWP - HW)))

    flops = 2 * B * (OC * CP * HW * K * K + OC * HW * NP)
    bytes_accessed = 4 * (x_flat.size + wtaps.size + bc2.size
                          + w2.size + bl2.size + B * NP)

    kernel = functools.partial(_plain_cnn_kernel, ksize=K, width=W, hw=HW, n_oc=OC)
    out = pl.pallas_call(
        kernel,
        out_shape=jax.ShapeDtypeStruct((B, 1, NP), f32),
        grid=(B,),
        in_specs=[
            pl.BlockSpec((None, CP, HWP), lambda b: (b, 0, 0)),
            pl.BlockSpec((K * K, OC, CP), lambda b: (0, 0, 0)),
            pl.BlockSpec((OC, 1), lambda b: (0, 0)),
            pl.BlockSpec((OC, HW, NP), lambda b: (0, 0, 0)),
            pl.BlockSpec((1, NP), lambda b: (0, 0)),
        ],
        out_specs=pl.BlockSpec((None, 1, NP), lambda b: (b, 0, 0)),
        compiler_params=pltpu.CompilerParams(dimension_semantics=("parallel",)),
        cost_estimate=pl.CostEstimate(flops=flops, transcendentals=0,
                                      bytes_accessed=bytes_accessed),
    )(x_flat, wtaps, bc2, w2, bl2)
    return out[:, 0, :hidden]


def _reference_forward(x, params, *, kernel_size=3):
    wc, bc, wl, bl = params["wc"], params["bc"], params["wl"], params["bl"]
    xs = x / 255.0
    conv = lax.conv_general_dilated(
        xs, wc, window_strides=(1, 1), padding="VALID",
        dimension_numbers=("NCHW", "OIHW", "NCHW"),
    ) + bc[None, :, None, None]
    h1 = jnp.maximum(conv, 0.0)
    flat = h1.reshape(x.shape[0], -1)
    return jnp.maximum(flat @ wl.T + bl, 0.0)


if __name__ == "__main__":
    # Small shapes consistent with the module: obs_shape=(4, 16, 16), hidden=32.
    B, C, H, W = 2, 4, 16, 16
    hidden = 32
    K, stride = 3, 1
    OC = hidden // 4
    OH, OW = H - K + stride, W - K + stride
    F = OC * OH * OW

    key = jax.random.PRNGKey(0)
    kx, kwc, kbc, kwl, kbl = jax.random.split(key, 5)

    # Deterministic synthetic parameters (PyTorch layout: Conv OIHW, Linear [out, in]).
    params = {
        "wc": 0.05 * jax.random.normal(kwc, (OC, C, K, K), jnp.float32),
        "bc": 0.05 * jax.random.normal(kbc, (OC,), jnp.float32),
        "wl": 0.02 * jax.random.normal(kwl, (hidden, F), jnp.float32),
        "bl": 0.02 * jax.random.normal(kbl, (hidden,), jnp.float32),
    }

    # Raw "pixel" observations in [0, 255).
    x = 255.0 * jax.random.uniform(kx, (B, C, H, W), jnp.float32)

    fwd = jax.jit(functools.partial(plain_cnn_forward, kernel_size=K, stride=stride))
    out = fwd(x, params)
    out = jax.block_until_ready(out)

    ref = _reference_forward(x, params, kernel_size=K)
    assert out.shape == (B, hidden)
    assert jnp.allclose(out, ref, atol=1e-3, rtol=1e-3), "mismatch vs reference"

    print("KERNEL_OK")
</pallas_src>

<mosaic_0001>
module attributes {stable_mosaic.version = 11 : i64} {
  func.func @_plain_cnn_kernel(%arg0: i32, %arg1: memref<1x8x384xf32, #tpu.memory_space<vmem>>, %arg2: memref<9x8x8xf32, #tpu.memory_space<vmem>>, %arg3: memref<8x1xf32, #tpu.memory_space<vmem>>, %arg4: memref<8x256x128xf32, #tpu.memory_space<vmem>>, %arg5: memref<1x128xf32, #tpu.memory_space<vmem>>, %arg6: memref<1x1x128xf32, #tpu.memory_space<vmem>>) attributes {dimension_semantics = [#tpu.dimension_semantics<parallel>], iteration_bounds = array<i64: 2>, scalar_prefetch = 0 : i64, scratch_operands = 0 : i64, tpu.core_type = #tpu.core_type<tc>, window_params = [{transform_indices = @transform_0, window_bounds = array<i64: 1, 8, 384>}, {pipeline_mode = #tpu.pipeline_mode<synchronous>, transform_indices = @transform_1, window_bounds = array<i64: 9, 8, 8>}, {pipeline_mode = #tpu.pipeline_mode<synchronous>, transform_indices = @transform_2, window_bounds = array<i64: 8, 1>}, {pipeline_mode = #tpu.pipeline_mode<synchronous>, transform_indices = @transform_3, window_bounds = array<i64: 8, 256, 128>}, {pipeline_mode = #tpu.pipeline_mode<synchronous>, transform_indices = @transform_4, window_bounds = array<i64: 1, 128>}, {transform_indices = @transform_5, window_bounds = array<i64: 1, 1, 128>}]} {
    %c0 = arith.constant 0 : index
    %c0_0 = arith.constant 0 : index
    %c0_1 = arith.constant 0 : index
    %0 = vector.load %arg1[%c0, %c0_0, %c0_1] : memref<1x8x384xf32, #tpu.memory_space<vmem>>, vector<1x8x384xf32>
    %1 = vector.shape_cast %0 : vector<1x8x384xf32> to vector<8x384xf32>
    %c0_2 = arith.constant 0 : index
    %c0_3 = arith.constant 0 : index
    %2 = vector.load %arg3[%c0_2, %c0_3] : memref<8x1xf32, #tpu.memory_space<vmem>>, vector<8x1xf32>
    %c0_4 = arith.constant 0 : index
    %c0_5 = arith.constant 0 : index
    %3 = vector.load %arg5[%c0_4, %c0_5] : memref<1x128xf32, #tpu.memory_space<vmem>>, vector<1x128xf32>
    %cst = arith.constant 0.000000e+00 : f32
    %4 = vector.broadcast %cst : f32 to vector<8x256xf32>
    %5 = vector.broadcast %2 : vector<8x1xf32> to vector<8x256xf32>
    %6 = arith.addf %4, %5 : vector<8x256xf32>
    %7 = vector.extract_strided_slice %1 {offsets = [0, 0], sizes = [8, 256], strides = [1, 1]} : vector<8x384xf32> to vector<8x256xf32>
    %c0_6 = arith.constant 0 : index
    %c0_7 = arith.constant 0 : index
    %c0_8 = arith.constant 0 : index
    %8 = vector.load %arg2[%c0_6, %c0_7, %c0_8] : memref<9x8x8xf32, #tpu.memory_space<vmem>>, vector<1x8x8xf32>
    %9 = vector.shape_cast %8 : vector<1x8x8xf32> to vector<8x8xf32>
    %cst_9 = arith.constant dense<0.000000e+00> : vector<8x256xf32>
    %10 = tpu.matmul %9, %7, %cst_9 {dimension_numbers = #tpu.dot_dimension_numbers<[1], [0], [0], [1], [0, 0, 1, 1], [], []>} : vector<8x8xf32>, vector<8x256xf32>, vector<8x256xf32> -> vector<8x256xf32>
    %11 = arith.addf %6, %10 : vector<8x256xf32>
    %12 = vector.extract_strided_slice %1 {offsets = [0, 1], sizes = [8, 256], strides = [1, 1]} : vector<8x384xf32> to vector<8x256xf32>
    %c1 = arith.constant 1 : index
    %c0_10 = arith.constant 0 : index
    %c0_11 = arith.constant 0 : index
    %13 = vector.load %arg2[%c1, %c0_10, %c0_11] : memref<9x8x8xf32, #tpu.memory_space<vmem>>, vector<1x8x8xf32>
    %14 = vector.shape_cast %13 : vector<1x8x8xf32> to vector<8x8xf32>
    %cst_12 = arith.constant dense<0.000000e+00> : vector<8x256xf32>
    %15 = tpu.matmul %14, %12, %cst_12 {dimension_numbers = #tpu.dot_dimension_numbers<[1], [0], [0], [1], [0, 0, 1, 1], [], []>} : vector<8x8xf32>, vector<8x256xf32>, vector<8x256xf32> -> vector<8x256xf32>
    %16 = arith.addf %11, %15 : vector<8x256xf32>
    %17 = vector.extract_strided_slice %1 {offsets = [0, 2], sizes = [8, 256], strides = [1, 1]} : vector<8x384xf32> to vector<8x256xf32>
    %c2 = arith.constant 2 : index
    %c0_13 = arith.constant 0 : index
    %c0_14 = arith.constant 0 : index
    %18 = vector.load %arg2[%c2, %c0_13, %c0_14] : memref<9x8x8xf32, #tpu.memory_space<vmem>>, vector<1x8x8xf32>
    %19 = vector.shape_cast %18 : vector<1x8x8xf32> to vector<8x8xf32>
    %cst_15 = arith.constant dense<0.000000e+00> : vector<8x256xf32>
    %20 = tpu.matmul %19, %17, %cst_15 {dimension_numbers = #tpu.dot_dimension_numbers<[1], [0], [0], [1], [0, 0, 1, 1], [], []>} : vector<8x8xf32>, vector<8x256xf32>, vector<8x256xf32> -> vector<8x256xf32>
    %21 = arith.addf %16, %20 : vector<8x256xf32>
    %22 = vector.extract_strided_slice %1 {offsets = [0, 16], sizes = [8, 256], strides = [1, 1]} : vector<8x384xf32> to vector<8x256xf32>
    %c3 = arith.constant 3 : index
    %c0_16 = arith.constant 0 : index
    %c0_17 = arith.constant 0 : index
    %23 = vector.load %arg2[%c3, %c0_16, %c0_17] : memref<9x8x8xf32, #tpu.memory_space<vmem>>, vector<1x8x8xf32>
    %24 = vector.shape_cast %23 : vector<1x8x8xf32> to vector<8x8xf32>
    %cst_18 = arith.constant dense<0.000000e+00> : vector<8x256xf32>
    %25 = tpu.matmul %24, %22, %cst_18 {dimension_numbers = #tpu.dot_dimension_numbers<[1], [0], [0], [1], [0, 0, 1, 1], [], []>} : vector<8x8xf32>, vector<8x256xf32>, vector<8x256xf32> -> vector<8x256xf32>
    %26 = arith.addf %21, %25 : vector<8x256xf32>
    %27 = vector.extract_strided_slice %1 {offsets = [0, 17], sizes = [8, 256], strides = [1, 1]} : vector<8x384xf32> to vector<8x256xf32>
    %c4 = arith.constant 4 : index
    %c0_19 = arith.constant 0 : index
    %c0_20 = arith.constant 0 : index
    %28 = vector.load %arg2[%c4, %c0_19, %c0_20] : memref<9x8x8xf32, #tpu.memory_space<vmem>>, vector<1x8x8xf32>
    %29 = vector.shape_cast %28 : vector<1x8x8xf32> to vector<8x8xf32>
    %cst_21 = arith.constant dense<0.000000e+00> : vector<8x256xf32>
    %30 = tpu.matmul %29, %27, %cst_21 {dimension_numbers = #tpu.dot_dimension_numbers<[1], [0], [0], [1], [0, 0, 1, 1], [], []>} : vector<8x8xf32>, vector<8x256xf32>, vector<8x256xf32> -> vector<8x256xf32>
    %31 = arith.addf %26, %30 : vector<8x256xf32>
    %32 = vector.extract_strided_slice %1 {offsets = [0, 18], sizes = [8, 256], strides = [1, 1]} : vector<8x384xf32> to vector<8x256xf32>
    %c5 = arith.constant 5 : index
    %c0_22 = arith.constant 0 : index
    %c0_23 = arith.constant 0 : index
    %33 = vector.load %arg2[%c5, %c0_22, %c0_23] : memref<9x8x8xf32, #tpu.memory_space<vmem>>, vector<1x8x8xf32>
    %34 = vector.shape_cast %33 : vector<1x8x8xf32> to vector<8x8xf32>
    %cst_24 = arith.constant dense<0.000000e+00> : vector<8x256xf32>
    %35 = tpu.matmul %34, %32, %cst_24 {dimension_numbers = #tpu.dot_dimension_numbers<[1], [0], [0], [1], [0, 0, 1, 1], [], []>} : vector<8x8xf32>, vector<8x256xf32>, vector<8x256xf32> -> vector<8x256xf32>
    %36 = arith.addf %31, %35 : vector<8x256xf32>
    %37 = vector.extract_strided_slice %1 {offsets = [0, 32], sizes = [8, 256], strides = [1, 1]} : vector<8x384xf32> to vector<8x256xf32>
    %c6 = arith.constant 6 : index
    %c0_25 = arith.constant 0 : index
    %c0_26 = arith.constant 0 : index
    %38 = vector.load %arg2[%c6, %c0_25, %c0_26] : memref<9x8x8xf32, #tpu.memory_space<vmem>>, vector<1x8x8xf32>
    %39 = vector.shape_cast %38 : vector<1x8x8xf32> to vector<8x8xf32>
    %cst_27 = arith.constant dense<0.000000e+00> : vector<8x256xf32>
    %40 = tpu.matmul %39, %37, %cst_27 {dimension_numbers = #tpu.dot_dimension_numbers<[1], [0], [0], [1], [0, 0, 1, 1], [], []>} : vector<8x8xf32>, vector<8x256xf32>, vector<8x256xf32> -> vector<8x256xf32>
    %41 = arith.addf %36, %40 : vector<8x256xf32>
    %42 = vector.extract_strided_slice %1 {offsets = [0, 33], sizes = [8, 256], strides = [1, 1]} : vector<8x384xf32> to vector<8x256xf32>
    %c7 = arith.constant 7 : index
    %c0_28 = arith.constant 0 : index
    %c0_29 = arith.constant 0 : index
    %43 = vector.load %arg2[%c7, %c0_28, %c0_29] : memref<9x8x8xf32, #tpu.memory_space<vmem>>, vector<1x8x8xf32>
    %44 = vector.shape_cast %43 : vector<1x8x8xf32> to vector<8x8xf32>
    %cst_30 = arith.constant dense<0.000000e+00> : vector<8x256xf32>
    %45 = tpu.matmul %44, %42, %cst_30 {dimension_numbers = #tpu.dot_dimension_numbers<[1], [0], [0], [1], [0, 0, 1, 1], [], []>} : vector<8x8xf32>, vector<8x256xf32>, vector<8x256xf32> -> vector<8x256xf32>
    %46 = arith.addf %41, %45 : vector<8x256xf32>
    %47 = vector.extract_strided_slice %1 {offsets = [0, 34], sizes = [8, 256], strides = [1, 1]} : vector<8x384xf32> to vector<8x256xf32>
    %c8 = arith.constant 8 : index
    %c0_31 = arith.constant 0 : index
    %c0_32 = arith.constant 0 : index
    %48 = vector.load %arg2[%c8, %c0_31, %c0_32] : memref<9x8x8xf32, #tpu.memory_space<vmem>>, vector<1x8x8xf32>
    %49 = vector.shape_cast %48 : vector<1x8x8xf32> to vector<8x8xf32>
    %cst_33 = arith.constant dense<0.000000e+00> : vector<8x256xf32>
    %50 = tpu.matmul %49, %47, %cst_33 {dimension_numbers = #tpu.dot_dimension_numbers<[1], [0], [0], [1], [0, 0, 1, 1], [], []>} : vector<8x8xf32>, vector<8x256xf32>, vector<8x256xf32> -> vector<8x256xf32>
    %51 = arith.addf %46, %50 : vector<8x256xf32>
    %cst_34 = arith.constant 0.000000e+00 : f32
    %52 = vector.broadcast %cst_34 : f32 to vector<8x256xf32>
    %53 = arith.maximumf %51, %52 : vector<8x256xf32>
    %cst_35 = arith.constant 0.000000e+00 : f32
    %54 = vector.broadcast %cst_35 : f32 to vector<1x128xf32>
    %55 = arith.addf %54, %3 : vector<1x128xf32>
    %56 = vector.extract_strided_slice %53 {offsets = [0, 0], sizes = [1, 256], strides = [1, 1]} : vector<8x256xf32> to vector<1x256xf32>
    %c0_36 = arith.constant 0 : index
    %c0_37 = arith.constant 0 : index
    %c0_38 = arith.constant 0 : index
    %57 = vector.load %arg4[%c0_36, %c0_37, %c0_38] : memref<8x256x128xf32, #tpu.memory_space<vmem>>, vector<1x256x128xf32>
    %58 = vector.shape_cast %57 : vector<1x256x128xf32> to vector<256x128xf32>
    %cst_39 = arith.constant dense<0.000000e+00> : vector<1x128xf32>
    %59 = tpu.matmul %56, %58, %cst_39 {dimension_numbers = #tpu.dot_dimension_numbers<[1], [0], [0], [1], [0, 0, 1, 1], [], []>} : vector<1x256xf32>, vector<256x128xf32>, vector<1x128xf32> -> vector<1x128xf32>
    %60 = arith.addf %55, %59 : vector<1x128xf32>
    %61 = vector.extract_strided_slice %53 {offsets = [1, 0], sizes = [1, 256], strides = [1, 1]} : vector<8x256xf32> to vector<1x256xf32>
    %c1_40 = arith.constant 1 : index
    %c0_41 = arith.constant 0 : index
    %c0_42 = arith.constant 0 : index
    %62 = vector.load %arg4[%c1_40, %c0_41, %c0_42] : memref<8x256x128xf32, #tpu.memory_space<vmem>>, vector<1x256x128xf32>
    %63 = vector.shape_cast %62 : vector<1x256x128xf32> to vector<256x128xf32>
    %cst_43 = arith.constant dense<0.000000e+00> : vector<1x128xf32>
    %64 = tpu.matmul %61, %63, %cst_43 {dimension_numbers = #tpu.dot_dimension_numbers<[1], [0], [0], [1], [0, 0, 1, 1], [], []>} : vector<1x256xf32>, vector<256x128xf32>, vector<1x128xf32> -> vector<1x128xf32>
    %65 = arith.addf %60, %64 : vector<1x128xf32>
    %66 = vector.extract_strided_slice %53 {offsets = [2, 0], sizes = [1, 256], strides = [1, 1]} : vector<8x256xf32> to vector<1x256xf32>
    %c2_44 = arith.constant 2 : index
    %c0_45 = arith.constant 0 : index
    %c0_46 = arith.constant 0 : index
    %67 = vector.load %arg4[%c2_44, %c0_45, %c0_46] : memref<8x256x128xf32, #tpu.memory_space<vmem>>, vector<1x256x128xf32>
    %68 = vector.shape_cast %67 : vector<1x256x128xf32> to vector<256x128xf32>
    %cst_47 = arith.constant dense<0.000000e+00> : vector<1x128xf32>
    %69 = tpu.matmul %66, %68, %cst_47 {dimension_numbers = #tpu.dot_dimension_numbers<[1], [0], [0], [1], [0, 0, 1, 1], [], []>} : vector<1x256xf32>, vector<256x128xf32>, vector<1x128xf32> -> vector<1x128xf32>
    %70 = arith.addf %65, %69 : vector<1x128xf32>
    %71 = vector.extract_strided_slice %53 {offsets = [3, 0], sizes = [1, 256], strides = [1, 1]} : vector<8x256xf32> to vector<1x256xf32>
    %c3_48 = arith.constant 3 : index
    %c0_49 = arith.constant 0 : index
    %c0_50 = arith.constant 0 : index
    %72 = vector.load %arg4[%c3_48, %c0_49, %c0_50] : memref<8x256x128xf32, #tpu.memory_space<vmem>>, vector<1x256x128xf32>
    %73 = vector.shape_cast %72 : vector<1x256x128xf32> to vector<256x128xf32>
    %cst_51 = arith.constant dense<0.000000e+00> : vector<1x128xf32>
    %74 = tpu.matmul %71, %73, %cst_51 {dimension_numbers = #tpu.dot_dimension_numbers<[1], [0], [0], [1], [0, 0, 1, 1], [], []>} : vector<1x256xf32>, vector<256x128xf32>, vector<1x128xf32> -> vector<1x128xf32>
    %75 = arith.addf %70, %74 : vector<1x128xf32>
    %76 = vector.extract_strided_slice %53 {offsets = [4, 0], sizes = [1, 256], strides = [1, 1]} : vector<8x256xf32> to vector<1x256xf32>
    %c4_52 = arith.constant 4 : index
    %c0_53 = arith.constant 0 : index
    %c0_54 = arith.constant 0 : index
    %77 = vector.load %arg4[%c4_52, %c0_53, %c0_54] : memref<8x256x128xf32, #tpu.memory_space<vmem>>, vector<1x256x128xf32>
    %78 = vector.shape_cast %77 : vector<1x256x128xf32> to vector<256x128xf32>
    %cst_55 = arith.constant dense<0.000000e+00> : vector<1x128xf32>
    %79 = tpu.matmul %76, %78, %cst_55 {dimension_numbers = #tpu.dot_dimension_numbers<[1], [0], [0], [1], [0, 0, 1, 1], [], []>} : vector<1x256xf32>, vector<256x128xf32>, vector<1x128xf32> -> vector<1x128xf32>
    %80 = arith.addf %75, %79 : vector<1x128xf32>
    %81 = vector.extract_strided_slice %53 {offsets = [5, 0], sizes = [1, 256], strides = [1, 1]} : vector<8x256xf32> to vector<1x256xf32>
    %c5_56 = arith.constant 5 : index
    %c0_57 = arith.constant 0 : index
    %c0_58 = arith.constant 0 : index
    %82 = vector.load %arg4[%c5_56, %c0_57, %c0_58] : memref<8x256x128xf32, #tpu.memory_space<vmem>>, vector<1x256x128xf32>
    %83 = vector.shape_cast %82 : vector<1x256x128xf32> to vector<256x128xf32>
    %cst_59 = arith.constant dense<0.000000e+00> : vector<1x128xf32>
    %84 = tpu.matmul %81, %83, %cst_59 {dimension_numbers = #tpu.dot_dimension_numbers<[1], [0], [0], [1], [0, 0, 1, 1], [], []>} : vector<1x256xf32>, vector<256x128xf32>, vector<1x128xf32> -> vector<1x128xf32>
    %85 = arith.addf %80, %84 : vector<1x128xf32>
    %86 = vector.extract_strided_slice %53 {offsets = [6, 0], sizes = [1, 256], strides = [1, 1]} : vector<8x256xf32> to vector<1x256xf32>
    %c6_60 = arith.constant 6 : index
    %c0_61 = arith.constant 0 : index
    %c0_62 = arith.constant 0 : index
    %87 = vector.load %arg4[%c6_60, %c0_61, %c0_62] : memref<8x256x128xf32, #tpu.memory_space<vmem>>, vector<1x256x128xf32>
    %88 = vector.shape_cast %87 : vector<1x256x128xf32> to vector<256x128xf32>
    %cst_63 = arith.constant dense<0.000000e+00> : vector<1x128xf32>
    %89 = tpu.matmul %86, %88, %cst_63 {dimension_numbers = #tpu.dot_dimension_numbers<[1], [0], [0], [1], [0, 0, 1, 1], [], []>} : vector<1x256xf32>, vector<256x128xf32>, vector<1x128xf32> -> vector<1x128xf32>
    %90 = arith.addf %85, %89 : vector<1x128xf32>
    %91 = vector.extract_strided_slice %53 {offsets = [7, 0], sizes = [1, 256], strides = [1, 1]} : vector<8x256xf32> to vector<1x256xf32>
    %c7_64 = arith.constant 7 : index
    %c0_65 = arith.constant 0 : index
    %c0_66 = arith.constant 0 : index
    %92 = vector.load %arg4[%c7_64, %c0_65, %c0_66] : memref<8x256x128xf32, #tpu.memory_space<vmem>>, vector<1x256x128xf32>
    %93 = vector.shape_cast %92 : vector<1x256x128xf32> to vector<256x128xf32>
    %cst_67 = arith.constant dense<0.000000e+00> : vector<1x128xf32>
    %94 = tpu.matmul %91, %93, %cst_67 {dimension_numbers = #tpu.dot_dimension_numbers<[1], [0], [0], [1], [0, 0, 1, 1], [], []>} : vector<1x256xf32>, vector<256x128xf32>, vector<1x128xf32> -> vector<1x128xf32>
    %95 = arith.addf %90, %94 : vector<1x128xf32>
    %cst_68 = arith.constant 0.000000e+00 : f32
    %96 = vector.broadcast %cst_68 : f32 to vector<1x128xf32>
    %97 = arith.maximumf %95, %96 : vector<1x128xf32>
    %c0_69 = arith.constant 0 : index
    %c0_70 = arith.constant 0 : index
    %c0_71 = arith.constant 0 : index
    %98 = vector.load %arg6[%c0_69, %c0_70, %c0_71] : memref<1x1x128xf32, #tpu.memory_space<vmem>>, vector<1x1x128xf32>
    %99 = vector.shape_cast %98 : vector<1x1x128xf32> to vector<1x128xf32>
    %100 = vector.shape_cast %97 : vector<1x128xf32> to vector<1x1x128xf32>
    tpu.vector_store %arg6[%c0_69, %c0_70, %c0_71], %100 {strides = array<i32>} : memref<1x1x128xf32, #tpu.memory_space<vmem>>, vector<1x1x128xf32>,
    return
  }
  func.func @transform_0(%arg0: i32) -> (i32, i32, i32) {
    %c0_i32 = arith.constant 0 : i32
    %c0_i32_0 = arith.constant 0 : i32
    %c0_i32_1 = arith.constant 0 : i32
    return %arg0, %c0_i32, %c0_i32_0 : i32, i32, i32
  }
  func.func @transform_1(%arg0: i32) -> (i32, i32, i32) {
    %c0_i32 = arith.constant 0 : i32
    %c0_i32_0 = arith.constant 0 : i32
    %c0_i32_1 = arith.constant 0 : i32
    %c0_i32_2 = arith.constant 0 : i32
    return %c0_i32, %c0_i32_0, %c0_i32_1 : i32, i32, i32
  }
  func.func @transform_2(%arg0: i32) -> (i32, i32) {
    %c0_i32 = arith.constant 0 : i32
    %c0_i32_0 = arith.constant 0 : i32
    %c0_i32_1 = arith.constant 0 : i32
    return %c0_i32, %c0_i32_0 : i32, i32
  }
  func.func @transform_3(%arg0: i32) -> (i32, i32, i32) {
    %c0_i32 = arith.constant 0 : i32
    %c0_i32_0 = arith.constant 0 : i32
    %c0_i32_1 = arith.constant 0 : i32
    %c0_i32_2 = arith.constant 0 : i32
    return %c0_i32, %c0_i32_0, %c0_i32_1 : i32, i32, i32
  }
  func.func @transform_4(%arg0: i32) -> (i32, i32) {
    %c0_i32 = arith.constant 0 : i32
    %c0_i32_0 = arith.constant 0 : i32
    %c0_i32_1 = arith.constant 0 : i32
    return %c0_i32, %c0_i32_0 : i32, i32
  }
  func.func @transform_5(%arg0: i32) -> (i32, i32, i32) {
    %c0_i32 = arith.constant 0 : i32
    %c0_i32_0 = arith.constant 0 : i32
    %c0_i32_1 = arith.constant 0 : i32
    return %arg0, %c0_i32, %c0_i32_0 : i32, i32, i32
  }
}

</mosaic_0001>

<bundles_post_ra>
// kernel: plain_cnn_forward.1
= control target key start
LH: loop header
LB: loop body
LE: loop exit
PB: predicated region body
PF: predicated region fallthrough
CT: control target
= control target key end

     0   :  { %10 = vsyncpa [#allocation3], 0  ;;  %s3858_s0 = inlined_call_operand.vmem [shape: f32[2,8,384], index: 0, kind: input, shape index: {}]   ;;  %s3859_s1 = inlined_call_operand.vmem [shape: f32[9,8,8], index: 1, kind: input, shape index: {}]   ;;  %s3860_s2 = inlined_call_operand.vmem [shape: f32[8,1], index: 2, kind: input, shape index: {}]   ;;  %s3861_s3 = inlined_call_operand.vmem [shape: f32[8,256,128], index: 3, kind: input, shape index: {}]   ;;  %s3862_s4 = inlined_call_operand.vmem [shape: f32[1,128], index: 4, kind: input, shape index: {}]   ;;  %s3863_s5 = inlined_call_operand.hbm [shape: f32[2,1,128], index: 5, kind: output, shape index: {}]  }
   0x1   :  { %12 = vsyncpa [#allocation3 + $0x1], 0  ;;  %s2919_s18 = smov 0   ;;  %s2921_s19 = smov 0  }
   0x2   :  { %s2923_s20 = smov 0   ;;  %s2925_s21 = smov 0  }
   0x3 LB: > { %s2940_s22 = sadd.s32 4294967295, %s2876_s21   ;;  %s1960_s23 = sadd.s32 4294967294, %s2876_s21   ;;  %s2876_s21 = sphi %s2925_s21, %s3869_s21   ;;  %s2872_s20 = sphi %s2923_s20, %s3868_s20   ;;  %s2868_s19 = sphi %s2921_s19, %s3867_s19   ;;  %s2864_s18 = sphi %s2919_s18, %s3866_s18  }
   0x4   : > { %s2944_s24 = sadd.s32 1, %s2876_s21   ;;  %s135_s25 = sadd.s32 1, %s2872_s20 }
   0x5   : > { %s132_s26 = ssub.s32 %s2876_s21, %s2944_s24  ;;  %p145_p0 = scmp.ne.s32.totalorder %s2872_s20, %s2868_s19 }
   0x6   : > { %p133_p1 = scmp.eq.s32.totalorder %s132_s26, 0  ;;  %p146_p2 = scmp.eq.s32.totalorder %s2940_s22, 1 }
   0x7   : > { %p151_p3 = scmp.ne.s32.totalorder %s2868_s19, %s2864_s18  ;;  %p152_p4 = scmp.eq.s32.totalorder %s1960_s23, 1 }
   0x8   : > { %s2955_s27 = scalar_select %p133_p1, %s2872_s20, %s135_s25  }
   0x9   : > { %p2957_p5 = por %p146_p2, %p145_p0  ;;  %p2961_p6 = por %p152_p4, %p151_p3 }
   0xa   : > { %p1963_p7 = scmp.ge.s32.totalorder %s2876_s21, 1  ;;  %p190_p8 = scmp.lt.s32.totalorder %s2876_s21, 3 }
   0xc   : > { %p191_p9 = pnand %p1963_p7, %p190_p8 }
   0xd   : > { %p217_p10 = scmp.lt.s32.totalorder (!%p191_p9), %s2940_s22, 1  ;;  %v2878_v0 = vmov (!%p191_p9), 0.0   ;;  %s2879_s10 = smov (!%p191_p9), 127   ;;  %v233_v3 = vld [vmem:[%s3859_s1] sm:$0xff] (!%p191_p9)  ;;  %vm234_vm0 = vcmask (!%p191_p9), 64512   ;;  %v1046_v7 = vld [vmem:[%s3861_s3 + $0x88] sm:$0xff] (!%p191_p9) }
   0xe   : > { %194 = sbr.rel (%p191_p9) target bundleno = 784 (0x310), region = 40  ;;  %302 = vmatprep.mubr.f32.mxu0 (!%p191_p9), %v2878_v0  ;;  %s2880_s13 = smov (!%p191_p9), 126   ;;  %v225_v5 = vld [vmem:[%s3860_s2] sm:$0xff] (!%p191_p9)  ;;  %v2887_v8 = vmov (!%p191_p9), 0   ;;  %v1030_v11 = vld [vmem:[%s3861_s3 + $0x8] sm:$0xff] (!%p191_p9)  ;;  %v1047_v13 = vld [vmem:[%s3861_s3 + $0x90] sm:$0xff] (!%p191_p9) }
   0xf   : > { %s2881_s14 = smov (!%p191_p9), 112   ;;  %s2882_s15 = smov (!%p191_p9), 111   ;;  %v1045_v6 = vld [vmem:[%s3861_s3 + $0x80] sm:$0xff] (!%p191_p9)  ;;  %2813 = vset.pattern.permute.xlu0 (!%p191_p9), %v2887_v8  ;;  %v1048_v14 = vld [vmem:[%s3861_s3 + $0x98] sm:$0xff] (!%p191_p9)  ;;  %v1031_v15 = vld [vmem:[%s3861_s3 + $0x10] sm:$0xff] (!%p191_p9)  ;;  %vm322_vm1 = vcmask (!%p191_p9), 1039360  }
  0x10   : > { %s2883_s16 = smov (!%p191_p9), 110   ;;  %s2884_s17 = smov (!%p191_p9), 96   ;;  %v2489_v9 = vpack.c.bf16 (!%p191_p9), %v1046_v7, %v1045_v6  ;;  %v1029_v10 = vld [vmem:[%s3861_s3] sm:$0xff] (!%p191_p9)  ;;  %v2493_v16 = vpack.c.bf16 (!%p191_p9), %v1048_v14, %v1047_v13  ;;  %v1032_v17 = vld [vmem:[%s3861_s3 + $0x18] sm:$0xff] (!%p191_p9)  ;;  %v1050_v20 = vld [vmem:[%s3861_s3 + $0xa8] sm:$0xff] (!%p191_p9)  ;;  %vm411_vm2 = vcmask (!%p191_p9), 1031168  }
  0x11   : > { %s2885_s23 = smov (!%p191_p9), 95   ;;  %s2886_s25 = smov (!%p191_p9), 94   ;;  %v2491_v12 = vpack.c.bf16 (!%p191_p9), %v1030_v11, %v1029_v10  ;;  %v2495_v18 = vpack.c.bf16 (!%p191_p9), %v1032_v17, %v1031_v15  ;;  %v1049_v19 = vld [vmem:[%s3861_s3 + $0xa0] sm:$0xff] (!%p191_p9)  ;;  %v1034_v22 = vld [vmem:[%s3861_s3 + $0x28] sm:$0xff] (!%p191_p9)  ;;  %v1051_v25 = vld [vmem:[%s3861_s3 + $0xb0] sm:$0xff] (!%p191_p9)  ;;  %vm500_vm3 = vcmask (!%p191_p9), 916480  }
  0x12   : > { %2490 = vmatprep.subr.bf16.mxu1 (!%p191_p9), %v2489_v9  ;;  %v1033_v21 = vld [vmem:[%s3861_s3 + $0x20] sm:$0xff] (!%p191_p9)  ;;  %v2497_v23 = vpack.c.bf16 (!%p191_p9), %v1050_v20, %v1049_v19  ;;  %v1052_v26 = vld [vmem:[%s3861_s3 + $0xb8] sm:$0xff] (!%p191_p9)  ;;  %v1035_v27 = vld [vmem:[%s3861_s3 + $0x30] sm:$0xff] (!%p191_p9)  ;;  %vm589_vm4 = vcmask (!%p191_p9), 908288   ;;  %vm678_vm5 = vcmask (!%p191_p9), 900096   ;;  %vm767_vm6 = vcmask (!%p191_p9), 785408  }
  0x13   : > { %2492 = vmatpush3.bf16.msra.mxu1 (!%p191_p9), %v2491_v12  ;;  %v2499_v24 = vpack.c.bf16 (!%p191_p9), %v1034_v22, %v1033_v21  ;;  %v2501_v28 = vpack.c.bf16 (!%p191_p9), %v1052_v26, %v1051_v25  ;;  %v1036_v29 = vld [vmem:[%s3861_s3 + $0x38] sm:$0xff] (!%p191_p9)  ;;  %v1053_v31 = vld [vmem:[%s3861_s3 + $0xc0] sm:$0xff] (!%p191_p9)  ;;  %v1054_v32 = vld [vmem:[%s3861_s3 + $0xc8] sm:$0xff] (!%p191_p9)  ;;  %vm856_vm7 = vcmask (!%p191_p9), 777216   ;;  %vm945_vm8 = vcmask (!%p191_p9), 769024   ;;  %s215_s8 = sand.u32 (!%p191_p9), 1, %s2868_s19  }
  0x14   : > { %2494 = vmatprep.subr.bf16.mxu1 (!%p191_p9), %v2493_v16  ;;  %v2503_v30 = vpack.c.bf16 (!%p191_p9), %v1036_v29, %v1035_v27  ;;  %v1037_v33 = vld [vmem:[%s3861_s3 + $0x40] sm:$0xff] (!%p191_p9)  ;;  %v2505_v34 = vpack.c.bf16 (!%p191_p9), %v1054_v32, %v1053_v31  ;;  %v1038_v35 = vld [vmem:[%s3861_s3 + $0x48] sm:$0xff] (!%p191_p9)  ;;  %v1055_v37 = vld [vmem:[%s3861_s3 + $0xd0] sm:$0xff] (!%p191_p9) }
  0x15   : > { %s218_s30 = scalar_select %p217_p10, %s2940_s22, 1  ;;  %v2507_v36 = vpack.c.bf16 %v1038_v35, %v1037_v33  ;;  %v1056_v38 = vld [vmem:[%s3861_s3 + $0xd8] sm:$0xff]  ;;  %v1039_v39 = vld [vmem:[%s3861_s3 + $0x50] sm:$0xff]  ;;  %v1057_v43 = vld [vmem:[%s3861_s3 + $0xe0] sm:$0xff] }
  0x16   : > { %v2509_v40 = vpack.c.bf16 %v1056_v38, %v1055_v37  ;;  %v1040_v41 = vld [vmem:[%s3861_s3 + $0x58] sm:$0xff]  ;;  %v1058_v44 = vld [vmem:[%s3861_s3 + $0xe8] sm:$0xff]  ;;  %v1041_v45 = vld [vmem:[%s3861_s3 + $0x60] sm:$0xff] }
  0x17   : > { %s2763_s6 = smul.u32 24, %s218_s30  ;;  %2496 = vmatpush3.bf16.msra.mxu1 %v2495_v18  ;;  %v2511_v42 = vpack.c.bf16 %v1040_v41, %v1039_v39  ;;  %v2513_v46 = vpack.c.bf16 %v1058_v44, %v1057_v43  ;;  %v1042_v47 = vld [vmem:[%s3861_s3 + $0x68] sm:$0xff]  ;;  %v1968_v62 = vld [vmem:[%s3859_s1 + $0x10] sm:$0xff]  ;;  %v1970_v6 = vld [vmem:[%s3859_s1 + $0x18] sm:$0xff] }
  0x18   : > { %2498 = vmatprep.subr.bf16.mxu1 %v2497_v23  ;;  %v2515_v48 = vpack.c.bf16 %v1042_v47, %v1041_v45  ;;  %v1966_v54 = vld [vmem:[%s3859_s1 + $0x8] sm:$0xff]  ;;  %v1972_v14 = vld [vmem:[%s3859_s1 + $0x20] sm:$0xff]  ;;  %v1976_v26 = vld [vmem:[%s3859_s1 + $0x30] sm:$0xff] }
  0x19   : > { %s221_s9 = scalar_lea.vmem %s3858_s0, %s2763_s6  ;;  %v1974_v21 = vld [vmem:[%s3859_s1 + $0x28] sm:$0xff]  ;;  %v2030_v31 = vld [vmem:[%s3861_s3 + $0x280] sm:$0xff]  ;;  %v1978_v33 = vld [vmem:[%s3859_s1 + $0x38] sm:$0xff] }
  0x1a   : > { %v223_v1 = vld [vmem:[%s221_s9 + $0x8] sm:$0xff]  ;;  %v222_v2 = vld [vmem:[%s221_s9] sm:$0xff]  ;;  %v224_v4 = vld [vmem:[%s221_s9 + $0x10] sm:$0xff]  ;;  %s2206_s9 = sshll.u32 %s2940_s22, 4  ;;  %s2888_s22 = smov [#allocation2]  }
  0x1b   : > { %318 = vrot.lane.b32.xlu0 %v223_v1, %s2879_s10  ;;  %316 = vrot.lane.b32.xlu1 %v222_v2, %s2879_s10  ;;  %v2031_v32 = vld [vmem:[%s3861_s3 + $0x288] sm:$0xff]  ;;  %v2032_v38 = vld [vmem:[%s3861_s3 + $0x290] sm:$0xff] }
  0x1c   : > { %238 = vmatprep.subr.mxu0 %v223_v1  ;;  %2500 = vmatpush3.bf16.msra.mxu1 %v2499_v24  ;;  %v2553_v35 = vpack.c.bf16 %v2031_v32, %v2030_v31  ;;  %v2015_v37 = vld [vmem:[%s3861_s3 + $0x208] sm:$0xff]  ;;  %v2033_v39 = vld [vmem:[%s3861_s3 + $0x298] sm:$0xff]  ;;  %v2034_v44 = vld [vmem:[%s3861_s3 + $0x2a0] sm:$0xff] }
  0x1d   : > { %239 = vmatpush1.msra.mxu0 %v222_v2  ;;  %2502 = vmatprep.subr.bf16.mxu1 %v2501_v28  ;;  %v2557_v41 = vpack.c.bf16 %v2033_v39, %v2032_v38  ;;  %v2017_v43 = vld [vmem:[%s3861_s3 + $0x218] sm:$0xff]  ;;  %v2035_v45 = vld [vmem:[%s3861_s3 + $0x2a8] sm:$0xff] }
  0x1e   : > { %1965 = vmatmul.mubr.msk.f32.vlgmr.msra.gmra.mrb[0].mxu0 %vm234_vm0, %v233_v3  ;;  %v2561_v47 = vpack.c.bf16 %v2035_v45, %v2034_v44  ;;  %v2001_v38 = vld [vmem:[%s3861_s3 + $0x198] sm:$0xff] }
  0x1f   : > { %320 = vrot.lane.b32.xlu0 %v224_v4, %s2879_s10  ;;  %407 = vrot.lane.b32.xlu1 %v223_v1, %s2880_s13  ;;  %v1985_v45 = vld [vmem:[%s3861_s3 + $0x118] sm:$0xff]  ;;  %s216_s10 = scalar_lea.vmem [#allocation2], %s215_s8 }
  0x20   : > { %394 = vmatprep.mubr.f32.mxu0 %v2878_v0  ;;  %2504 = vmatpush3.bf16.msra.mxu1 %v2503_v30  ;;  %s1905_s11 = sshll.u32 %s216_s10, 4  ;;  %s3818_s11 = int_to_ptr.vmem [resolvable:$true] %s1905_s11 }
  0x21   : > { %2506 = vmatprep.subr.bf16.mxu1 %v2505_v34 }
  0x23   : > { %409 = vrot.lane.b32.xlu0 %v224_v4, %s2880_s13  ;;  %405 = vrot.lane.b32.xlu1 %v222_v2, %s2880_s13 }
  0x24   : > { %2508 = vmatpush3.bf16.msra.mxu1 %v2507_v36  ;;  %v2014_v36 = vld [vmem:[%s3861_s3 + $0x200] sm:$0xff] }
  0x25   : > { %2510 = vmatprep.subr.bf16.mxu1 %v2509_v40  ;;  %v2555_v40 = vpack.c.bf16 %v2015_v37, %v2014_v36  ;;  %v2000_v37 = vld [vmem:[%s3861_s3 + $0x190] sm:$0xff] }
  0x26   : > { %v2525_v44 = vpack.c.bf16 %v2001_v38, %v2000_v37  ;;  %v2010_v37 = vld [vmem:[%s3861_s3 + $0x1e0] sm:$0xff]  ;;  %v2011_v38 = vld [vmem:[%s3861_s3 + $0x1e8] sm:$0xff] }
  0x27   : > { %496 = vrot.lane.b32.xlu0 %v223_v1, %s2881_s14  ;;  %498 = vrot.lane.b32.xlu1 %v224_v4, %s2881_s14 }
  0x28   : > { %2512 = vmatpush3.bf16.msra.mxu1 %v2511_v42  ;;  %v2016_v42 = vld [vmem:[%s3861_s3 + $0x210] sm:$0xff] }
  0x29   : > { %2514 = vmatprep.subr.bf16.mxu1 %v2513_v46  ;;  %v2559_v46 = vpack.c.bf16 %v2017_v43, %v2016_v42  ;;  %v2079_v42 = vld [vmem:[%s3861_s3 + $0x408] sm:$0xff]  ;;  %v1984_v43 = vld [vmem:[%s3861_s3 + $0x110] sm:$0xff] }
  0x2b   : > { %494 = vrot.lane.b32.xlu0 %v222_v2, %s2881_s14  ;;  %585 = vrot.lane.b32.xlu1 %v223_v1, %s2882_s15  ;;  %s3816_s14 = scalar_lea.hbm %s3863_s5, %s2206_s9 }
  0x2c   : > { %2516 = vmatpush3.bf16.msra.mxu1 %v2515_v48  ;;  %v2018_v48 = vld [vmem:[%s3861_s3 + $0x220] sm:$0xff] }
  0x2f   : > { %587 = vrot.lane.b32.xlu0 %v224_v4, %s2882_s15  ;;  %583 = vrot.lane.b32.xlu1 %v222_v2, %s2882_s15  ;;  %s1893_s15 = scalar_lea.sflag [#allocation3], %s215_s8 }
  0x33   : > { %674 = vrot.lane.b32.xlu0 %v223_v1, %s2883_s16  ;;  %676 = vrot.lane.b32.xlu1 %v224_v4, %s2883_s16 }
  0x37   : > { %672 = vrot.lane.b32.xlu0 %v222_v2, %s2883_s16  ;;  %763 = vrot.lane.b32.xlu1 %v223_v1, %s2884_s17  ;;  %s2814_s16 = scalar_lea.vmem %s3818_s11, 16 }
  0x38   : > { %p2815_p11 = scmp.ne.s32.totalorder %s3818_s11, %s2814_s16 }
  0x3a   : > { %p2816_p12 = pnand %p2815_p11, %p2957_p5 }
  0x3b   : > { %765 = vrot.lane.b32.xlu0 %v224_v4, %s2884_s17  ;;  %761 = vrot.lane.b32.xlu1 %v222_v2, %s2884_s17  ;;  %s2818_s17 = sshll.u32 %s2888_s22, 4  ;;  %s2819_s17 = int_to_ptr.vmem [resolvable:$false] %s2818_s17 }
  0x3c   : > { %p2817_p13 = pneg %p2816_p12  ;;  %p2821_p0 = scmp.lt.s32.totalorder %s3818_s11, %s2819_s17 }
  0x3f   : > { %852 = vrot.lane.b32.xlu0 %v223_v1, %s2885_s23  ;;  %854 = vrot.lane.b32.xlu1 %v224_v4, %s2885_s23 }
  0x43   : > { %850 = vrot.lane.b32.xlu0 %v222_v2, %s2885_s23  ;;  %941 = vrot.lane.b32.xlu1 %v223_v1, %s2886_s25  ;;  %s2820_s23 = scalar_lea.vmem %s2819_s17, 32 }
  0x44   : > { %p2822_p1 = scmp.lt.s32.totalorder %s2820_s23, %s2814_s16 }
  0x46   : > { %p2823_p2 = por %p2822_p1, %p2821_p0 }
  0x47   : > { %943 = vrot.lane.b32.xlu0 %v224_v4, %s2886_s25  ;;  %939 = vrot.lane.b32.xlu1 %v222_v2, %s2886_s25 }
  0x48   : > { %p2824_p3 = pnand %p2823_p2, %p2817_p13 }
  0x4b   : > { %229 = vperm.xlu0 %2813, %v225_v5  }
  0x8d   : > { %v319_v49 = vpop.permute.xlu0 %318  ;;  %v317_v50 = vpop.permute.xlu1 %316 }
  0x8e   : > { %v323_v55 = vsel %vm322_vm1, %v317_v50, %v319_v49  ;;  %v2036_v50 = vld [vmem:[%s3861_s3 + $0x2b0] sm:$0xff] }
  0x91   : > { %v321_v51 = vpop.permute.xlu0 %320  ;;  %v408_v52 = vpop.permute.xlu1 %407 }
  0x92   : > { %v324_v53 = vsel %vm322_vm1, %v319_v49, %v321_v51  ;;  %v2019_v49 = vld [vmem:[%s3861_s3 + $0x228] sm:$0xff]  ;;  %v2037_v51 = vld [vmem:[%s3861_s3 + $0x2b8] sm:$0xff] }
  0x93   : > { %330 = vmatprep.subr.mxu0 %v324_v53  ;;  %v2565_v53 = vpack.c.bf16 %v2037_v51, %v2036_v50  ;;  %v2002_v50 = vld [vmem:[%s3861_s3 + $0x1a0] sm:$0xff]  ;;  %v2003_v51 = vld [vmem:[%s3861_s3 + $0x1a8] sm:$0xff] }
  0x94   : > { %331 = vmatpush1.msra.mxu0 %v323_v55  ;;  %v2021_v55 = vld [vmem:[%s3861_s3 + $0x238] sm:$0xff] }
  0x95   : > { %v410_v56 = vpop.permute.xlu0 %409  ;;  %1967 = vmatmul.mubr.msk.f32.vlgmr.msra.gmra.mrb[0].mxu0 %vm234_vm0, %v1966_v54  ;;  %v406_v57 = vpop.permute.xlu1 %405  ;;  %v2020_v54 = vld [vmem:[%s3861_s3 + $0x230] sm:$0xff] }
  0x96   : > { %v412_v58 = vsel %vm411_vm2, %v406_v57, %v408_v52  ;;  %v413_v59 = vsel %vm411_vm2, %v408_v52, %v410_v56  ;;  %483 = vmatprep.mubr.f32.mxu0 %v2878_v0  ;;  %v2563_v52 = vpack.c.bf16 %v2019_v49, %v2018_v48  ;;  %v2038_v56 = vld [vmem:[%s3861_s3 + $0x2c0] sm:$0xff]  ;;  %v2039_v57 = vld [vmem:[%s3861_s3 + $0x2c8] sm:$0xff] }
  0x97   : > { %419 = vmatprep.subr.mxu0 %v413_v59  ;;  %v2569_v59 = vpack.c.bf16 %v2039_v57, %v2038_v56  ;;  %v2080_v56 = vld [vmem:[%s3861_s3 + $0x410] sm:$0xff]  ;;  %v2081_v57 = vld [vmem:[%s3861_s3 + $0x418] sm:$0xff] }
  0x98   : > { %420 = vmatpush1.msra.mxu0 %v412_v58  ;;  %v2567_v58 = vpack.c.bf16 %v2021_v55, %v2020_v54  ;;  %v2527_v54 = vpack.c.bf16 %v1985_v45, %v1984_v43  ;;  %v2088_v43 = vld [vmem:[%s3861_s3 + $0x450] sm:$0xff]  ;;  %v1994_v45 = vld [vmem:[%s3861_s3 + $0x160] sm:$0xff] }
  0x99   : > { %v497_v60 = vpop.permute.xlu0 %496  ;;  %v499_v61 = vpop.permute.xlu1 %498 }
  0x9a   : > { %v502_v63 = vsel %vm500_vm3, %v497_v60, %v499_v61  ;;  %v2023_v61 = vld [vmem:[%s3861_s3 + $0x248] sm:$0xff] }
  0x9b   : > { %508 = vmatprep.subr.mxu0 %v502_v63  ;;  %v2041_v63 = vld [vmem:[%s3861_s3 + $0x2d8] sm:$0xff] }
  0x9d   : > { %1969 = vmatmul.mubr.msk.f32.vlgmr.msra.gmra.mrb[0].mxu0 %vm234_vm0, %v1968_v62  ;;  %v495_v1 = vpop.permute.xlu0 %494  ;;  %v586_v2 = vpop.permute.xlu1 %585  ;;  %v2040_v62 = vld [vmem:[%s3861_s3 + $0x2d0] sm:$0xff] }
  0x9e   : > { %v501_v3 = vsel %vm500_vm3, %v495_v1, %v497_v60  ;;  %572 = vmatprep.mubr.f32.mxu0 %v2878_v0  ;;  %v2022_v60 = vld [vmem:[%s3861_s3 + $0x240] sm:$0xff] }
  0x9f   : > { %509 = vmatpush1.msra.mxu0 %v501_v3  ;;  %v2571_v1 = vpack.c.bf16 %v2023_v61, %v2022_v60  ;;  %v2024_v3 = vld [vmem:[%s3861_s3 + $0x250] sm:$0xff]  ;;  %v2529_v60 = vpack.c.bf16 %v2003_v51, %v2002_v50  ;;  %v1987_v61 = vld [vmem:[%s3861_s3 + $0x128] sm:$0xff]  ;;  %v2013_v51 = vld [vmem:[%s3861_s3 + $0x1f8] sm:$0xff] }
  0xa0   : > { %v2012_v50 = vld [vmem:[%s3861_s3 + $0x1f0] sm:$0xff] }
  0xa1   : > { %v588_v4 = vpop.permute.xlu0 %587  ;;  %v584_v5 = vpop.permute.xlu1 %583 }
  0xa2   : > { %v591_v7 = vsel %vm589_vm4, %v586_v2, %v588_v4  ;;  %v590_v8 = vsel %vm589_vm4, %v584_v5, %v586_v2  ;;  %v2573_v2 = vpack.c.bf16 %v2041_v63, %v2040_v62  ;;  %v2025_v4 = vld [vmem:[%s3861_s3 + $0x258] sm:$0xff]  ;;  %v2098_v62 = vld [vmem:[%s3861_s3 + $0x4a0] sm:$0xff]  ;;  %v2099_v63 = vld [vmem:[%s3861_s3 + $0x4a8] sm:$0xff] }
  0xa3   : > { %597 = vmatprep.subr.mxu0 %v591_v7  ;;  %v2575_v5 = vpack.c.bf16 %v2025_v4, %v2024_v3  ;;  %v2043_v7 = vld [vmem:[%s3861_s3 + $0x2e8] sm:$0xff]  ;;  %v2623_v3 = vpack.c.bf16 %v2081_v57, %v2080_v56  ;;  %v1996_v57 = vld [vmem:[%s3861_s3 + $0x170] sm:$0xff] }
  0xa4   : > { %v2091_v56 = vld [vmem:[%s3861_s3 + $0x468] sm:$0xff] }
  0xa5   : > { %1971 = vmatmul.mubr.msk.f32.vlgmr.msra.gmra.mrb[0].mxu0 %vm234_vm0, %v1970_v6  ;;  %v675_v9 = vpop.permute.xlu0 %674  ;;  %v677_v10 = vpop.permute.xlu1 %676  ;;  %v2042_v6 = vld [vmem:[%s3861_s3 + $0x2e0] sm:$0xff] }
  0xa6   : > { %598 = vmatpush1.msra.mxu0 %v590_v8  ;;  %661 = vmatprep.mubr.f32.mxu0 %v2878_v0  ;;  %v680_v11 = vsel %vm678_vm5, %v675_v9, %v677_v10  ;;  %v2577_v8 = vpack.c.bf16 %v2043_v7, %v2042_v6  ;;  %v2027_v10 = vld [vmem:[%s3861_s3 + $0x268] sm:$0xff]  ;;  %v2082_v6 = vld [vmem:[%s3861_s3 + $0x420] sm:$0xff] }
  0xa7   : > { %686 = vmatprep.subr.mxu0 %v680_v11  ;;  %v2083_v7 = vld [vmem:[%s3861_s3 + $0x428] sm:$0xff] }
  0xa9   : > { %v673_v12 = vpop.permute.xlu0 %672  ;;  %v764_v13 = vpop.permute.xlu1 %763 }
  0xaa   : > { %v679_v15 = vsel %vm678_vm5, %v673_v12, %v675_v9  ;;  %v2026_v9 = vld [vmem:[%s3861_s3 + $0x260] sm:$0xff]  ;;  %v1059_v12 = vld [vmem:[%s3861_s3 + $0xf0] sm:$0xff] }
  0xab   : > { %v2579_v11 = vpack.c.bf16 %v2027_v10, %v2026_v9  ;;  %v1989_v10 = vld [vmem:[%s3861_s3 + $0x138] sm:$0xff] }
  0xad   : > { %1973 = vmatmul.mubr.msk.f32.vlgmr.msra.gmra.mrb[0].mxu0 %vm234_vm0, %v1972_v14  ;;  %v766_v16 = vpop.permute.xlu0 %765  ;;  %v762_v17 = vpop.permute.xlu1 %761 }
  0xae   : > { %687 = vmatpush1.msra.mxu0 %v679_v15  ;;  %750 = vmatprep.mubr.f32.mxu0 %v2878_v0  ;;  %v769_v18 = vsel %vm767_vm6, %v764_v13, %v766_v16  ;;  %v768_v22 = vsel %vm767_vm6, %v762_v17, %v764_v13  ;;  %v1060_v13 = vld [vmem:[%s3861_s3 + $0xf8] sm:$0xff]  ;;  %v1043_v15 = vld [vmem:[%s3861_s3 + $0x70] sm:$0xff] }
  0xaf   : > { %775 = vmatprep.subr.mxu0 %v769_v18  ;;  %v2517_v14 = vpack.c.bf16 %v1060_v13, %v1059_v12  ;;  %v1044_v16 = vld [vmem:[%s3861_s3 + $0x78] sm:$0xff]  ;;  %v2044_v18 = vld [vmem:[%s3861_s3 + $0x2f0] sm:$0xff]  ;;  %v2006_v13 = vld [vmem:[%s3861_s3 + $0x1c0] sm:$0xff] }
  0xb0   : > { %v2519_v17 = vpack.c.bf16 %v1044_v16, %v1043_v15  ;;  %v2101_v12 = vld [vmem:[%s3861_s3 + $0x4b8] sm:$0xff]  ;;  %v2627_v15 = vpack.c.bf16 %v2083_v7, %v2082_v6  ;;  %v2046_v7 = vld [vmem:[%s3861_s3 + $0x300] sm:$0xff] }
  0xb1   : > { %v853_v19 = vpop.permute.xlu0 %852  ;;  %v855_v20 = vpop.permute.xlu1 %854  ;;  %2518 = vmatprep.subr.bf16.mxu1 %v2517_v14  ;;  %v2007_v14 = vld [vmem:[%s3861_s3 + $0x1c8] sm:$0xff] }
  0xb2   : > { %v858_v23 = vsel %vm856_vm7, %v853_v19, %v855_v20  ;;  %2520 = vmatpush3.bf16.msra.mxu1 %v2519_v17 }
  0xb5   : > { %1975 = vmatmul.mubr.msk.f32.vlgmr.msra.gmra.mrb[0].mxu0 %vm234_vm0, %v1974_v21  ;;  %v851_v24 = vpop.permute.xlu0 %850  ;;  %v942_v27 = vpop.permute.xlu1 %941  ;;  %v2028_v21 = vld [vmem:[%s3861_s3 + $0x270] sm:$0xff] }
  0xb6   : > { %776 = vmatpush1.msra.mxu0 %v768_v22  ;;  %839 = vmatprep.mubr.f32.mxu0 %v2878_v0  ;;  %v857_v28 = vsel %vm856_vm7, %v851_v24, %v853_v19  ;;  %v2045_v19 = vld [vmem:[%s3861_s3 + $0x2f8] sm:$0xff]  ;;  %v1998_v24 = vld [vmem:[%s3861_s3 + $0x180] sm:$0xff] }
  0xb7   : > { %864 = vmatprep.subr.mxu0 %v858_v23  ;;  %v2581_v20 = vpack.c.bf16 %v2045_v19, %v2044_v18  ;;  %v2029_v22 = vld [vmem:[%s3861_s3 + $0x278] sm:$0xff]  ;;  %v2084_v18 = vld [vmem:[%s3861_s3 + $0x430] sm:$0xff] }
  0xb8   : > { %v2583_v23 = vpack.c.bf16 %v2029_v22, %v2028_v21  ;;  %v2085_v19 = vld [vmem:[%s3861_s3 + $0x438] sm:$0xff]  ;;  %v2537_v21 = vpack.c.bf16 %v2007_v14, %v2006_v13  ;;  %v1991_v22 = vld [vmem:[%s3861_s3 + $0x148] sm:$0xff] }
  0xb9   : > { %v944_v25 = vpop.permute.xlu0 %943  ;;  %v940_v30 = vpop.permute.xlu1 %939 }
  0xba   : > { %v947_v29 = vsel %vm945_vm8, %v942_v27, %v944_v25  ;;  %v946_v34 = vsel %vm945_vm8, %v940_v30, %v942_v27  ;;  %v1999_v25 = vld [vmem:[%s3861_s3 + $0x188] sm:$0xff]  ;;  %v2094_v27 = vld [vmem:[%s3861_s3 + $0x480] sm:$0xff] }
  0xbd   : > { %1977 = vmatmul.mubr.msk.f32.vlgmr.msra.gmra.mrb[0].mxu0 %vm234_vm0, %v1976_v26  ;;  %v2521_v26 = vpack.c.bf16 %v1999_v25, %v1998_v24  ;;  %v2103_v24 = vld [vmem:[%s3861_s3 + $0x4c8] sm:$0xff]  ;;  %v2008_v25 = vld [vmem:[%s3861_s3 + $0x1d0] sm:$0xff] }
  0xbe   : > { %865 = vmatpush1.msra.mxu0 %v857_v28  ;;  %928 = vmatprep.mubr.f32.mxu0 %v2878_v0  ;;  %v2095_v28 = vld [vmem:[%s3861_s3 + $0x488] sm:$0xff] }
  0xbf   : > { %953 = vmatprep.subr.mxu0 %v947_v29  ;;  %2522 = vmatprep.subr.bf16.mxu1 %v2521_v26  ;;  %v2617_v29 = vpack.c.bf16 %v2095_v28, %v2094_v27  ;;  %v2009_v26 = vld [vmem:[%s3861_s3 + $0x1d8] sm:$0xff]  ;;  %v2631_v27 = vpack.c.bf16 %v2085_v19, %v2084_v18 }
  0xc5   : > { %1979 = vmatmul.mubr.msk.f32.vlgmr.msra.gmra.mrb[0].mxu0 %vm234_vm0, %v1978_v33 }
  0xc6   : > { %954 = vmatpush1.msra.mxu0 %v946_v34  ;;  %1017 = vmatprep.mubr.f32.mxu0 %v2878_v0  ;;  %v1980_v0 = vld [vmem:[%s3859_s1 + $0x40] sm:$0xff] }
  0xc7   : > { %2554 = vmatprep.subr.bf16.mxu0 %v2553_v35  ;;  %v1982_v34 = vld [vmem:[%s3861_s3 + $0x100] sm:$0xff]  ;;  %v1983_v35 = vld [vmem:[%s3861_s3 + $0x108] sm:$0xff] }
  0xca   : > { %v230_v30 = vpop.permute.xlu0 %229 }
  0xcd   : > { %1981 = vmatmul.mubr.msk.f32.vlgmr.msra.gmra.mrb[0].mxu0 %vm234_vm0, %v1980_v0 }
  0xce   : > { %2556 = vmatpush3.bf16.msra.mxu0 %v2555_v40  ;;  %v2523_v40 = vpack.c.bf16 %v1983_v35, %v1982_v34  ;;  %v1993_v34 = vld [vmem:[%s3861_s3 + $0x158] sm:$0xff]  ;;  %v2104_v35 = vld [vmem:[%s3861_s3 + $0x4d0] sm:$0xff] }
  0xcf   : > { %2558 = vmatprep.subr.bf16.mxu0 %v2557_v41  ;;  %v2078_v41 = vld [vmem:[%s3861_s3 + $0x400] sm:$0xff] }
  0xd2   : > { %2560 = vmatpush3.bf16.msra.mxu0 %v2559_v46  ;;  %v2096_v46 = vld [vmem:[%s3861_s3 + $0x490] sm:$0xff] }
  0xd3   : > { %2562 = vmatprep.subr.bf16.mxu0 %v2561_v47  ;;  %v2097_v47 = vld [vmem:[%s3861_s3 + $0x498] sm:$0xff] }
  0xd4   : > { %v2621_v55 = vpack.c.bf16 %v2097_v47, %v2096_v46  ;;  %v2545_v46 = vpack.c.bf16 %v2011_v38, %v2010_v37  ;;  %v1995_v47 = vld [vmem:[%s3861_s3 + $0x168] sm:$0xff]  ;;  %v2162_v37 = vld [vmem:[%s3861_s3 + $0x6a0] sm:$0xff] }
  0xd5   : > { %v2163_v38 = vld [vmem:[%s3861_s3 + $0x6a8] sm:$0xff] }
  0xd6   : > { %2564 = vmatpush3.bf16.msra.mxu0 %v2563_v52  ;;  %v2619_v52 = vpack.c.bf16 %v2079_v42, %v2078_v41 }
  0xd7   : > { %2566 = vmatprep.subr.bf16.mxu0 %v2565_v53 }
  0xda   : > { %2568 = vmatpush3.bf16.msra.mxu0 %v2567_v58  ;;  %v1986_v58 = vld [vmem:[%s3861_s3 + $0x120] sm:$0xff] }
  0xdb   : > { %2570 = vmatprep.subr.bf16.mxu0 %v2569_v59  ;;  %v2531_v4 = vpack.c.bf16 %v1987_v61, %v1986_v58  ;;  %v2549_v58 = vpack.c.bf16 %v2013_v51, %v2012_v50  ;;  %v2109_v61 = vld [vmem:[%s3861_s3 + $0x4f8] sm:$0xff]  ;;  %v2164_v50 = vld [vmem:[%s3861_s3 + $0x6b0] sm:$0xff] }
  0xdc   : > { %v2165_v51 = vld [vmem:[%s3861_s3 + $0x6b8] sm:$0xff] }
  0xde   : > { %2572 = vmatpush3.bf16.msra.mxu0 %v2571_v1  ;;  %v2004_v1 = vld [vmem:[%s3861_s3 + $0x1b0] sm:$0xff] }
  0xdf   : > { %2574 = vmatprep.subr.bf16.mxu0 %v2573_v2  ;;  %v2005_v2 = vld [vmem:[%s3861_s3 + $0x1b8] sm:$0xff] }
  0xe0   : > { %v2533_v9 = vpack.c.bf16 %v2005_v2, %v2004_v1 }
  0xe2   : > { %2576 = vmatpush3.bf16.msra.mxu0 %v2575_v5  ;;  %v2625_v5 = vpack.c.bf16 %v2099_v63, %v2098_v62  ;;  %v2062_v62 = vld [vmem:[%s3861_s3 + $0x380] sm:$0xff]  ;;  %v2063_v63 = vld [vmem:[%s3861_s3 + $0x388] sm:$0xff] }
  0xe3   : > { %2578 = vmatprep.subr.bf16.mxu0 %v2577_v8  ;;  %v1988_v8 = vld [vmem:[%s3861_s3 + $0x130] sm:$0xff]  ;;  %v2585_v6 = vpack.c.bf16 %v2063_v63, %v2062_v62  ;;  %v2166_v62 = vld [vmem:[%s3861_s3 + $0x6c0] sm:$0xff]  ;;  %v2167_v63 = vld [vmem:[%s3861_s3 + $0x6c8] sm:$0xff] }
  0xe4   : > { %v2535_v16 = vpack.c.bf16 %v1989_v10, %v1988_v8  ;;  %v2047_v8 = vld [vmem:[%s3861_s3 + $0x308] sm:$0xff] }
  0xe5   : > { %v2159_v10 = vld [vmem:[%s3861_s3 + $0x688] sm:$0xff]  ;;  %v2587_v14 = vpack.c.bf16 %v2047_v8, %v2046_v7  ;;  %v2056_v8 = vld [vmem:[%s3861_s3 + $0x350] sm:$0xff] }
  0xe6   : > { %2580 = vmatpush3.bf16.msra.mxu0 %v2579_v11  ;;  %v2100_v11 = vld [vmem:[%s3861_s3 + $0x4b0] sm:$0xff]  ;;  %v2151_v7 = vld [vmem:[%s3861_s3 + $0x648] sm:$0xff] }
  0xe7   : > { %2582 = vmatprep.subr.bf16.mxu0 %v2581_v20  ;;  %v2629_v17 = vpack.c.bf16 %v2101_v12, %v2100_v11  ;;  %v1990_v20 = vld [vmem:[%s3861_s3 + $0x140] sm:$0xff]  ;;  %v2064_v11 = vld [vmem:[%s3861_s3 + $0x390] sm:$0xff]  ;;  %v2065_v12 = vld [vmem:[%s3861_s3 + $0x398] sm:$0xff] }
  0xe8   : > { %v2539_v28 = vpack.c.bf16 %v1991_v22, %v1990_v20  ;;  %v2589_v20 = vpack.c.bf16 %v2065_v12, %v2064_v11  ;;  %v2160_v22 = vld [vmem:[%s3861_s3 + $0x690] sm:$0xff]  ;;  %v2169_v12 = vld [vmem:[%s3861_s3 + $0x6d8] sm:$0xff] }
  0xe9   : > { %v2168_v11 = vld [vmem:[%s3861_s3 + $0x6d0] sm:$0xff] }
  0xea   : > { %2584 = vmatpush3.bf16.msra.mxu0 %v2583_v23  ;;  %v2102_v23 = vld [vmem:[%s3861_s3 + $0x4c0] sm:$0xff] }
  0xeb   : > { %2618 = vmatprep.subr.bf16.mxu0 %v2617_v29  ;;  %v2633_v29 = vpack.c.bf16 %v2103_v24, %v2102_v23  ;;  %v2161_v23 = vld [vmem:[%s3861_s3 + $0x698] sm:$0xff] }
 0x1a0   : > { %v1019_v31 = vpop.f32.mrb[0].mxu0 }
 0x1a1   : > { %v2745_v32 = vadd.f32 %v1019_v31, %v230_v30  ;;  %v1021_v33 = vpop.f32.mrb[1].mxu0  ;;  %v2087_v31 = vld [vmem:[%s3861_s3 + $0x448] sm:$0xff] }
 0x1a2   : > { %v2746_v36 = vadd.f32 %v1021_v33, %v230_v30  ;;  %v2086_v30 = vld [vmem:[%s3861_s3 + $0x440] sm:$0xff]  ;;  %v2541_v33 = vpack.c.bf16 %v2009_v26, %v2008_v25  ;;  %v2067_v26 = vld [vmem:[%s3861_s3 + $0x3a8] sm:$0xff] }
 0x1a3   : > { %v3236_v39 = vmax.f32 %v2745_v32, 0.0  ;;  %v1992_v32 = vld [vmem:[%s3861_s3 + $0x150] sm:$0xff]  ;;  %v2066_v25 = vld [vmem:[%s3861_s3 + $0x3a0] sm:$0xff] }
 0x1a4   : > { %v3238_v0 = vmax.f32 %v2746_v36, 0.0  ;;  %v2105_v36 = vld [vmem:[%s3861_s3 + $0x4d8] sm:$0xff]  ;;  %v2543_v41 = vpack.c.bf16 %v1993_v34, %v1992_v32 }
 0x1a5   : > { %v1275_v53 = vrot.slane %v3236_v39, 2  ;;  %v2637_v42 = vpack.c.bf16 %v2105_v36, %v2104_v35  ;;  %v1167_v18 = vrot.slane %v3236_v39, 1  ;;  %v2145_v32 = vld [vmem:[%s3861_s3 + $0x618] sm:$0xff]  ;;  %v2593_v35 = vpack.c.bf16 %v2067_v26, %v2066_v25  ;;  %v2051_v36 = vld [vmem:[%s3861_s3 + $0x328] sm:$0xff]  ;;  %v2076_v25 = vld [vmem:[%s3861_s3 + $0x3f0] sm:$0xff] }
 0x1a6   : > { %1125 = vmatprep.mubr.f32.mxu1 %v3238_v0  ;;  %v1168_v48 = vrot.slane %v3238_v0, 1  ;;  %v1276_v49 = vrot.slane %v3238_v0, 2  ;;  %v1492_v59 = vrot.slane %v3238_v0, 4  ;;  %v1384_v24 = vrot.slane %v3238_v0, 3  ;;  %v2077_v26 = vld [vmem:[%s3861_s3 + $0x3f8] sm:$0xff] }
 0x1a7   : > { %1126 = vmatmul.mubr.f32.vlgmr.msra.gmra.mrb[0].mxu1 %v3236_v39  ;;  %v1708_v34 = vrot.slane %v3238_v0, 6 }
 0x1a8   : > { %2524 = vmatpush3.bf16.msra.mxu1 %v2523_v40  ;;  %1235 = vmatprep.mubr.f32.mxu1 %v1168_v48  ;;  %v2635_v40 = vpack.c.bf16 %v2087_v31, %v2086_v30  ;;  %v2106_v48 = vld [vmem:[%s3861_s3 + $0x4e0] sm:$0xff]  ;;  %v2685_v30 = vpack.c.bf16 %v2161_v23, %v2160_v22  ;;  %v2144_v31 = vld [vmem:[%s3861_s3 + $0x610] sm:$0xff]  ;;  %v2059_v22 = vld [vmem:[%s3861_s3 + $0x368] sm:$0xff] }
 0x1a9   : > { %1343 = vmatprep.mubr.f32.mxu0 %v1276_v49  ;;  %2526 = vmatprep.subr.bf16.mxu1 %v2525_v44  ;;  %v2089_v44 = vld [vmem:[%s3861_s3 + $0x458] sm:$0xff]  ;;  %v2107_v49 = vld [vmem:[%s3861_s3 + $0x4e8] sm:$0xff]  ;;  %v2170_v23 = vld [vmem:[%s3861_s3 + $0x6e0] sm:$0xff] }
 0x1aa   : > { %1344 = vmatmul.mubr.f32.vlgmr.msra.gmra.mrb[2].mxu0 %v1275_v53  ;;  %v2547_v53 = vpack.c.bf16 %v1995_v47, %v1994_v45  ;;  %v2146_v45 = vld [vmem:[%s3861_s3 + $0x620] sm:$0xff]  ;;  %v2052_v47 = vld [vmem:[%s3861_s3 + $0x330] sm:$0xff] }
 0x1ab   : > { %2620 = vmatpush3.bf16.msra.mxu0 %v2619_v52  ;;  %1559 = vmatprep.mubr.f32.mxu0 %v1492_v59  ;;  %v2639_v52 = vpack.c.bf16 %v2089_v44, %v2088_v43  ;;  %v1997_v59 = vld [vmem:[%s3861_s3 + $0x178] sm:$0xff]  ;;  %v2689_v44 = vpack.c.bf16 %v2163_v38, %v2162_v37  ;;  %v2126_v37 = vld [vmem:[%s3861_s3 + $0x580] sm:$0xff]  ;;  %v2127_v38 = vld [vmem:[%s3861_s3 + $0x588] sm:$0xff] }
 0x1ac   : > { %2528 = vmatpush3.bf16.msra.mxu1 %v2527_v54  ;;  %2622 = vmatprep.subr.bf16.mxu0 %v2621_v55  ;;  %v2641_v54 = vpack.c.bf16 %v2107_v49, %v2106_v48  ;;  %v2090_v55 = vld [vmem:[%s3861_s3 + $0x460] sm:$0xff]  ;;  %v2551_v2 = vpack.c.bf16 %v1997_v59, %v1996_v57  ;;  %v2053_v49 = vld [vmem:[%s3861_s3 + $0x338] sm:$0xff]  ;;  %v2148_v57 = vld [vmem:[%s3861_s3 + $0x630] sm:$0xff] }
 0x1ad   : > { %2530 = vmatprep.subr.bf16.mxu1 %v2529_v60  ;;  %v2108_v60 = vld [vmem:[%s3861_s3 + $0x4f0] sm:$0xff]  ;;  %v2643_v1 = vpack.c.bf16 %v2091_v56, %v2090_v55  ;;  %v2599_v55 = vpack.c.bf16 %v2053_v49, %v2052_v47  ;;  %v2693_v56 = vpack.c.bf16 %v2165_v51, %v2164_v50  ;;  %v2054_v59 = vld [vmem:[%s3861_s3 + $0x340] sm:$0xff]  ;;  %v2111_v47 = vld [vmem:[%s3861_s3 + $0x508] sm:$0xff] }
 0x1ae   : > { %v2129_v49 = vld [vmem:[%s3861_s3 + $0x598] sm:$0xff] }
 0x1af   : > { %2624 = vmatpush3.bf16.msra.mxu0 %v2623_v3  ;;  %v2645_v3 = vpack.c.bf16 %v2109_v61, %v2108_v60  ;;  %v2055_v61 = vld [vmem:[%s3861_s3 + $0x348] sm:$0xff] }
 0x1b0   : > { %2532 = vmatpush3.bf16.msra.mxu1 %v2531_v4  ;;  %2626 = vmatprep.subr.bf16.mxu0 %v2625_v5  ;;  %v2092_v4 = vld [vmem:[%s3861_s3 + $0x470] sm:$0xff]  ;;  %v2093_v5 = vld [vmem:[%s3861_s3 + $0x478] sm:$0xff] }
 0x1b1   : > { %2534 = vmatprep.subr.bf16.mxu1 %v2533_v9  ;;  %v2158_v9 = vld [vmem:[%s3861_s3 + $0x680] sm:$0xff]  ;;  %v2647_v13 = vpack.c.bf16 %v2093_v5, %v2092_v4  ;;  %v2603_v4 = vpack.c.bf16 %v2055_v61, %v2054_v59  ;;  %v2697_v5 = vpack.c.bf16 %v2167_v63, %v2166_v62  ;;  %v1707_v59 = vrot.slane %v3236_v39, 6  ;;  %v2115_v63 = vld [vmem:[%s3861_s3 + $0x528] sm:$0xff] }
 0x1b2   : > { %v2681_v19 = vpack.c.bf16 %v2159_v10, %v2158_v9  ;;  %v2057_v10 = vld [vmem:[%s3861_s3 + $0x358] sm:$0xff]  ;;  %v2114_v62 = vld [vmem:[%s3861_s3 + $0x520] sm:$0xff] }
 0x1b3   : > { %2628 = vmatpush3.bf16.msra.mxu0 %v2627_v15  ;;  %v2142_v15 = vld [vmem:[%s3861_s3 + $0x600] sm:$0xff] }
 0x1b4   : > { %2536 = vmatpush3.bf16.msra.mxu1 %v2535_v16  ;;  %2630 = vmatprep.subr.bf16.mxu0 %v2629_v17  ;;  %v2143_v16 = vld [vmem:[%s3861_s3 + $0x608] sm:$0xff]  ;;  %v2048_v17 = vld [vmem:[%s3861_s3 + $0x310] sm:$0xff] }
 0x1b5   : > { %2538 = vmatprep.subr.bf16.mxu1 %v2537_v21  ;;  %v2049_v21 = vld [vmem:[%s3861_s3 + $0x318] sm:$0xff] }
 0x1b7   : > { %2632 = vmatpush3.bf16.msra.mxu0 %v2631_v27  ;;  %v2683_v27 = vpack.c.bf16 %v2143_v16, %v2142_v15  ;;  %v2607_v16 = vpack.c.bf16 %v2057_v10, %v2056_v8  ;;  %v2135_v8 = vld [vmem:[%s3861_s3 + $0x5c8] sm:$0xff] }
 0x1b8   : > { %2540 = vmatpush3.bf16.msra.mxu1 %v2539_v28  ;;  %2634 = vmatprep.subr.bf16.mxu0 %v2633_v29  ;;  %v1491_v28 = vrot.slane %v3236_v39, 4  ;;  %v2591_v29 = vpack.c.bf16 %v2049_v21, %v2048_v17  ;;  %v2701_v17 = vpack.c.bf16 %v2169_v12, %v2168_v11  ;;  %v2118_v11 = vld [vmem:[%s3861_s3 + $0x540] sm:$0xff]  ;;  %v2119_v12 = vld [vmem:[%s3861_s3 + $0x548] sm:$0xff] }
 0x1b9   : > { %2542 = vmatprep.subr.bf16.mxu1 %v2541_v33  ;;  %v2050_v33 = vld [vmem:[%s3861_s3 + $0x320] sm:$0xff] }
 0x1ba   : > { %v2595_v43 = vpack.c.bf16 %v2051_v36, %v2050_v33  ;;  %v2613_v33 = vpack.c.bf16 %v2077_v26, %v2076_v25  ;;  %v2173_v36 = vld [vmem:[%s3861_s3 + $0x6f8] sm:$0xff]  ;;  %v2140_v25 = vld [vmem:[%s3861_s3 + $0x5f0] sm:$0xff] }
 0x1bb   : > { %2636 = vmatpush3.bf16.msra.mxu0 %v2635_v40  ;;  %v2068_v40 = vld [vmem:[%s3861_s3 + $0x3b0] sm:$0xff]  ;;  %v2141_v26 = vld [vmem:[%s3861_s3 + $0x5f8] sm:$0xff] }
 0x1bc   : > { %2544 = vmatpush3.bf16.msra.mxu1 %v2543_v41  ;;  %2638 = vmatprep.subr.bf16.mxu0 %v2637_v42  ;;  %v2069_v41 = vld [vmem:[%s3861_s3 + $0x3b8] sm:$0xff]  ;;  %v2687_v42 = vpack.c.bf16 %v2145_v32, %v2144_v31  ;;  %v2155_v31 = vld [vmem:[%s3861_s3 + $0x668] sm:$0xff]  ;;  %v2060_v32 = vld [vmem:[%s3861_s3 + $0x370] sm:$0xff] }
 0x1bd   : > { %2546 = vmatprep.subr.bf16.mxu1 %v2545_v46  ;;  %v2147_v46 = vld [vmem:[%s3861_s3 + $0x628] sm:$0xff]  ;;  %v2597_v48 = vpack.c.bf16 %v2069_v41, %v2068_v40 }
 0x1bf   : > { %2640 = vmatpush3.bf16.msra.mxu0 %v2639_v52  ;;  %v2070_v52 = vld [vmem:[%s3861_s3 + $0x3c0] sm:$0xff] }
 0x1c0   : > { %2548 = vmatpush3.bf16.msra.mxu1 %v2547_v53  ;;  %2642 = vmatprep.subr.bf16.mxu0 %v2641_v54  ;;  %v2071_v53 = vld [vmem:[%s3861_s3 + $0x3c8] sm:$0xff]  ;;  %v2691_v54 = vpack.c.bf16 %v2147_v46, %v2146_v45  ;;  %v2649_v45 = vpack.c.bf16 %v2127_v38, %v2126_v37  ;;  %v2110_v46 = vld [vmem:[%s3861_s3 + $0x500] sm:$0xff]  ;;  %v2192_v37 = vld [vmem:[%s3861_s3 + $0x790] sm:$0xff] }
 0x1c1   : > { %2550 = vmatprep.subr.bf16.mxu1 %v2549_v58  ;;  %v2149_v58 = vld [vmem:[%s3861_s3 + $0x638] sm:$0xff]  ;;  %v2601_v60 = vpack.c.bf16 %v2071_v53, %v2070_v52  ;;  %v2651_v51 = vpack.c.bf16 %v2111_v47, %v2110_v46  ;;  %v1383_v52 = vrot.slane %v3236_v39, 3  ;;  %v2194_v46 = vld [vmem:[%s3861_s3 + $0x7a0] sm:$0xff]  ;;  %v2195_v47 = vld [vmem:[%s3861_s3 + $0x7a8] sm:$0xff] }
 0x1c2   : > { %v2193_v38 = vld [vmem:[%s3861_s3 + $0x798] sm:$0xff] }
 0x1c3   : > { %2644 = vmatpush3.bf16.msra.mxu0 %v2643_v1  ;;  %v2072_v1 = vld [vmem:[%s3861_s3 + $0x3d0] sm:$0xff] }
 0x1c4   : > { %2552 = vmatpush3.bf16.msra.mxu1 %v2551_v2  ;;  %2646 = vmatprep.subr.bf16.mxu0 %v2645_v3  ;;  %v2073_v2 = vld [vmem:[%s3861_s3 + $0x3d8] sm:$0xff]  ;;  %v2695_v3 = vpack.c.bf16 %v2149_v58, %v2148_v57  ;;  %v2130_v57 = vld [vmem:[%s3861_s3 + $0x5a0] sm:$0xff]  ;;  %v2131_v58 = vld [vmem:[%s3861_s3 + $0x5a8] sm:$0xff] }
 0x1c5   : > { %2586 = vmatprep.subr.bf16.mxu1 %v2585_v6  ;;  %v2150_v6 = vld [vmem:[%s3861_s3 + $0x640] sm:$0xff]  ;;  %v2605_v9 = vpack.c.bf16 %v2073_v2, %v2072_v1  ;;  %v2657_v61 = vpack.c.bf16 %v2131_v58, %v2130_v57  ;;  %v2132_v1 = vld [vmem:[%s3861_s3 + $0x5b0] sm:$0xff]  ;;  %v2133_v2 = vld [vmem:[%s3861_s3 + $0x5b8] sm:$0xff] }
 0x1c6   : > { %v2699_v15 = vpack.c.bf16 %v2151_v7, %v2150_v6  ;;  %v2117_v6 = vld [vmem:[%s3861_s3 + $0x538] sm:$0xff]  ;;  %v2134_v7 = vld [vmem:[%s3861_s3 + $0x5c0] sm:$0xff]  ;;  %v2199_v58 = vld [vmem:[%s3861_s3 + $0x7c8] sm:$0xff] }
 0x1c7   : > { %2648 = vmatpush3.bf16.msra.mxu0 %v2647_v13  ;;  %1236 = vmatmul.mubr.f32.vlgmr.msra.gmra.mrb[2].mxu1 %v1167_v18  ;;  %v2074_v13 = vld [vmem:[%s3861_s3 + $0x3e0] sm:$0xff]  ;;  %v2152_v18 = vld [vmem:[%s3861_s3 + $0x650] sm:$0xff]  ;;  %v2665_v10 = vpack.c.bf16 %v2135_v8, %v2134_v7  ;;  %v2203_v7 = vld [vmem:[%s3861_s3 + $0x7e8] sm:$0xff] }
 0x1c8   : > { %2588 = vmatpush3.bf16.msra.mxu1 %v2587_v14  ;;  %1451 = vmatprep.mubr.f32.mxu1 %v1384_v24  ;;  %v2075_v14 = vld [vmem:[%s3861_s3 + $0x3e8] sm:$0xff]  ;;  %v2198_v57 = vld [vmem:[%s3861_s3 + $0x7c0] sm:$0xff] }
 0x1c9   : > { %2682 = vmatprep.subr.bf16.mxu0 %v2681_v19  ;;  %2590 = vmatprep.subr.bf16.mxu1 %v2589_v20  ;;  %v2153_v19 = vld [vmem:[%s3861_s3 + $0x658] sm:$0xff]  ;;  %v2058_v20 = vld [vmem:[%s3861_s3 + $0x360] sm:$0xff]  ;;  %v2609_v21 = vpack.c.bf16 %v2075_v14, %v2074_v13  ;;  %v2171_v24 = vld [vmem:[%s3861_s3 + $0x6e8] sm:$0xff] }
 0x1ca   : > { %1560 = vmatmul.mubr.f32.vlgmr.msra.gmra.mrb[4].mxu0 %v1491_v28  ;;  %v2611_v28 = vpack.c.bf16 %v2059_v22, %v2058_v20  ;;  %v2136_v13 = vld [vmem:[%s3861_s3 + $0x5d0] sm:$0xff]  ;;  %v2137_v14 = vld [vmem:[%s3861_s3 + $0x5d8] sm:$0xff]  ;;  %v2139_v20 = vld [vmem:[%s3861_s3 + $0x5e8] sm:$0xff] }
 0x1cb   : > { %2684 = vmatpush3.bf16.msra.mxu0 %v2683_v27  ;;  %1775 = vmatprep.mubr.f32.mxu0 %v1708_v34  ;;  %v2703_v27 = vpack.c.bf16 %v2153_v19, %v2152_v18  ;;  %v2061_v34 = vld [vmem:[%s3861_s3 + $0x378] sm:$0xff]  ;;  %v2138_v19 = vld [vmem:[%s3861_s3 + $0x5e0] sm:$0xff] }
 0x1cc   : > { %2592 = vmatpush3.bf16.msra.mxu1 %v2591_v29  ;;  %2686 = vmatprep.subr.bf16.mxu0 %v2685_v30  ;;  %v2705_v29 = vpack.c.bf16 %v2171_v24, %v2170_v23  ;;  %v2154_v30 = vld [vmem:[%s3861_s3 + $0x660] sm:$0xff]  ;;  %v2615_v41 = vpack.c.bf16 %v2061_v34, %v2060_v32  ;;  %v2121_v18 = vld [vmem:[%s3861_s3 + $0x558] sm:$0xff]  ;;  %v2673_v22 = vpack.c.bf16 %v2139_v20, %v2138_v19  ;;  %v2123_v24 = vld [vmem:[%s3861_s3 + $0x568] sm:$0xff]  ;;  %v1815_v19 = vrot.slane %v3236_v39, 7 }
 0x1cd   : > { %2594 = vmatprep.subr.bf16.mxu1 %v2593_v35  ;;  %v2172_v35 = vld [vmem:[%s3861_s3 + $0x6f0] sm:$0xff]  ;;  %v2707_v40 = vpack.c.bf16 %v2155_v31, %v2154_v30  ;;  %v2122_v23 = vld [vmem:[%s3861_s3 + $0x560] sm:$0xff]  ;;  %v2125_v30 = vld [vmem:[%s3861_s3 + $0x578] sm:$0xff] }
 0x1ce   : > { %v2190_v31 = vld [vmem:[%s3861_s3 + $0x780] sm:$0xff]  ;;  %v2191_v32 = vld [vmem:[%s3861_s3 + $0x788] sm:$0xff] }
 0x1cf   : > { %2688 = vmatpush3.bf16.msra.mxu0 %v2687_v42  ;;  %v2709_v42 = vpack.c.bf16 %v2173_v36, %v2172_v35  ;;  %v2713_v34 = vpack.c.bf16 %v2191_v32, %v2190_v31  ;;  %v2174_v35 = vld [vmem:[%s3861_s3 + $0x700] sm:$0xff]  ;;  %v2175_v36 = vld [vmem:[%s3861_s3 + $0x708] sm:$0xff] }
 0x1d0   : > { %2596 = vmatpush3.bf16.msra.mxu1 %v2595_v43  ;;  %2690 = vmatprep.subr.bf16.mxu0 %v2689_v44  ;;  %v2156_v43 = vld [vmem:[%s3861_s3 + $0x670] sm:$0xff]  ;;  %v2157_v44 = vld [vmem:[%s3861_s3 + $0x678] sm:$0xff] }
 0x1d1   : > { %2598 = vmatprep.subr.bf16.mxu1 %v2597_v48  ;;  %v2128_v48 = vld [vmem:[%s3861_s3 + $0x590] sm:$0xff]  ;;  %v2711_v50 = vpack.c.bf16 %v2157_v44, %v2156_v43  ;;  %v2177_v44 = vld [vmem:[%s3861_s3 + $0x718] sm:$0xff] }
 0x1d2   : > { %v2653_v53 = vpack.c.bf16 %v2129_v49, %v2128_v48  ;;  %v2176_v43 = vld [vmem:[%s3861_s3 + $0x710] sm:$0xff]  ;;  %v2721_v49 = vpack.c.bf16 %v2195_v47, %v2194_v46 }
 0x1d3   : > { %2692 = vmatpush3.bf16.msra.mxu0 %v2691_v54  ;;  %v2112_v54 = vld [vmem:[%s3861_s3 + $0x510] sm:$0xff]  ;;  %v2719_v48 = vpack.c.bf16 %v2177_v44, %v2176_v43 }
 0x1d4   : > { %2600 = vmatpush3.bf16.msra.mxu1 %v2599_v55  ;;  %2694 = vmatprep.subr.bf16.mxu0 %v2693_v56  ;;  %v2113_v55 = vld [vmem:[%s3861_s3 + $0x518] sm:$0xff]  ;;  %v1600_v56 = vrot.slane %v3238_v0, 5 }
 0x1d5   : > { %2602 = vmatprep.subr.bf16.mxu1 %v2601_v60  ;;  %v2655_v60 = vpack.c.bf16 %v2113_v55, %v2112_v54  ;;  %v2180_v55 = vld [vmem:[%s3861_s3 + $0x730] sm:$0xff] }
 0x1d7   : > { %2696 = vmatpush3.bf16.msra.mxu0 %v2695_v3  ;;  %v2659_v3 = vpack.c.bf16 %v2115_v63, %v2114_v62  ;;  %v2183_v62 = vld [vmem:[%s3861_s3 + $0x748] sm:$0xff]  ;;  %v2200_v63 = vld [vmem:[%s3861_s3 + $0x7d0] sm:$0xff] }
 0x1d8   : > { %2604 = vmatpush3.bf16.msra.mxu1 %v2603_v4  ;;  %2698 = vmatprep.subr.bf16.mxu0 %v2697_v5  ;;  %v2661_v4 = vpack.c.bf16 %v2133_v2, %v2132_v1  ;;  %v2116_v5 = vld [vmem:[%s3861_s3 + $0x530] sm:$0xff]  ;;  %v2201_v1 = vld [vmem:[%s3861_s3 + $0x7d8] sm:$0xff] }
 0x1d9   : > { %2606 = vmatprep.subr.bf16.mxu1 %v2605_v9  ;;  %v2663_v9 = vpack.c.bf16 %v2117_v6, %v2116_v5  ;;  %v2185_v5 = vld [vmem:[%s3861_s3 + $0x758] sm:$0xff]  ;;  %v2202_v6 = vld [vmem:[%s3861_s3 + $0x7e0] sm:$0xff] }
 0x1db   : > { %2700 = vmatpush3.bf16.msra.mxu0 %v2699_v15  ;;  %v2667_v15 = vpack.c.bf16 %v2119_v12, %v2118_v11  ;;  %v2187_v11 = vld [vmem:[%s3861_s3 + $0x768] sm:$0xff]  ;;  %v2204_v12 = vld [vmem:[%s3861_s3 + $0x7f0] sm:$0xff] }
 0x1dc   : > { %2608 = vmatpush3.bf16.msra.mxu1 %v2607_v16  ;;  %2702 = vmatprep.subr.bf16.mxu0 %v2701_v17  ;;  %v2669_v16 = vpack.c.bf16 %v2137_v14, %v2136_v13  ;;  %v2120_v17 = vld [vmem:[%s3861_s3 + $0x550] sm:$0xff]  ;;  %v2205_v13 = vld [vmem:[%s3861_s3 + $0x7f8] sm:$0xff] }
 0x1dd   : > { %2610 = vmatprep.subr.bf16.mxu1 %v2609_v21  ;;  %v2671_v21 = vpack.c.bf16 %v2121_v18, %v2120_v17  ;;  %v2189_v17 = vld [vmem:[%s3861_s3 + $0x778] sm:$0xff] }
 0x1df   : > { %2704 = vmatpush3.bf16.msra.mxu0 %v2703_v27  ;;  %v2675_v27 = vpack.c.bf16 %v2123_v24, %v2122_v23 }
 0x1e0   : > { %2612 = vmatpush3.bf16.msra.mxu1 %v2611_v28  ;;  %2706 = vmatprep.subr.bf16.mxu0 %v2705_v29  ;;  %v2677_v28 = vpack.c.bf16 %v2141_v26, %v2140_v25  ;;  %v2124_v29 = vld [vmem:[%s3861_s3 + $0x570] sm:$0xff]  ;;  %v226_v26 = vld [vmem:[%s3862_s4] sm:$0x1] }
 0x1e1   : > { %2614 = vmatprep.subr.bf16.mxu1 %v2613_v33  ;;  %v2679_v33 = vpack.c.bf16 %v2125_v30, %v2124_v29 }
 0x1e3   : > { %2708 = vmatpush3.bf16.msra.mxu0 %v2707_v40  ;;  %v2715_v40 = vpack.c.bf16 %v2175_v36, %v2174_v35 }
 0x1e4   : > { %2616 = vmatpush3.bf16.msra.mxu1 %v2615_v41  ;;  %2710 = vmatprep.subr.bf16.mxu0 %v2709_v42  ;;  %v1599_v41 = vrot.slane %v3236_v39, 5  ;;  %v2717_v42 = vpack.c.bf16 %v2193_v38, %v2192_v37 }
 0x1e5   : > { %2650 = vmatprep.subr.bf16.mxu1 %v2649_v45  ;;  %v1816_v45 = vrot.slane %v3238_v0, 7  ;;  %v2179_v0 = vld [vmem:[%s3861_s3 + $0x728] sm:$0xff] }
 0x1e7   : > { %2712 = vmatpush3.bf16.msra.mxu0 %v2711_v50  ;;  %1452 = vmatmul.mubr.f32.vlgmr.msra.gmra.mrb[4].mxu1 %v1383_v52  ;;  %v2178_v50 = vld [vmem:[%s3861_s3 + $0x720] sm:$0xff]  ;;  %v2197_v52 = vld [vmem:[%s3861_s3 + $0x7b8] sm:$0xff] }
 0x1e8   : > { %2652 = vmatpush3.bf16.msra.mxu1 %v2651_v51  ;;  %1667 = vmatprep.mubr.f32.mxu1 %v1600_v56  ;;  %v2196_v51 = vld [vmem:[%s3861_s3 + $0x7b0] sm:$0xff]  ;;  %v2181_v56 = vld [vmem:[%s3861_s3 + $0x738] sm:$0xff] }
 0x1e9   : > { %2654 = vmatprep.subr.bf16.mxu1 %v2653_v53  ;;  %v2723_v53 = vpack.c.bf16 %v2179_v0, %v2178_v50  ;;  %v2725_v54 = vpack.c.bf16 %v2197_v52, %v2196_v51 }
 0x1ea   : > { %1776 = vmatmul.mubr.f32.vlgmr.msra.gmra.mrb[6].mxu0 %v1707_v59  ;;  %v2727_v59 = vpack.c.bf16 %v2181_v56, %v2180_v55 }
 0x1ec   : > { %2656 = vmatpush3.bf16.msra.mxu1 %v2655_v60  ;;  %v2729_v60 = vpack.c.bf16 %v2199_v58, %v2198_v57 }
 0x1ed   : > { %2658 = vmatprep.subr.bf16.mxu1 %v2657_v61  ;;  %v2182_v61 = vld [vmem:[%s3861_s3 + $0x740] sm:$0xff] }
 0x1ee   : > { %v2731_v2 = vpack.c.bf16 %v2183_v62, %v2182_v61 }
 0x1f0   : > { %2660 = vmatpush3.bf16.msra.mxu1 %v2659_v3  ;;  %v2733_v3 = vpack.c.bf16 %v2201_v1, %v2200_v63 }
 0x1f1   : > { %2662 = vmatprep.subr.bf16.mxu1 %v2661_v4  ;;  %v2184_v4 = vld [vmem:[%s3861_s3 + $0x750] sm:$0xff] }
 0x1f2   : > { %v2735_v8 = vpack.c.bf16 %v2185_v5, %v2184_v4 }
 0x1f4   : > { %2664 = vmatpush3.bf16.msra.mxu1 %v2663_v9  ;;  %v2737_v9 = vpack.c.bf16 %v2203_v7, %v2202_v6 }
 0x1f5   : > { %2666 = vmatprep.subr.bf16.mxu1 %v2665_v10  ;;  %v2186_v10 = vld [vmem:[%s3861_s3 + $0x760] sm:$0xff] }
 0x1f6   : > { %v2739_v14 = vpack.c.bf16 %v2187_v11, %v2186_v10 }
 0x1f8   : > { %2668 = vmatpush3.bf16.msra.mxu1 %v2667_v15  ;;  %v2741_v15 = vpack.c.bf16 %v2205_v13, %v2204_v12 }
 0x1f9   : > { %2670 = vmatprep.subr.bf16.mxu1 %v2669_v16  ;;  %v2188_v16 = vld [vmem:[%s3861_s3 + $0x770] sm:$0xff] }
 0x1fa   : > { %v2743_v18 = vpack.c.bf16 %v2189_v17, %v2188_v16 }
 0x1fc   : > { %2672 = vmatpush3.bf16.msra.mxu1 %v2671_v21 }
 0x1fd   : > { %2674 = vmatprep.subr.bf16.mxu1 %v2673_v22 }
 0x200   : > { %2676 = vmatpush3.bf16.msra.mxu1 %v2675_v27 }
 0x201   : > { %2678 = vmatprep.subr.bf16.mxu1 %v2677_v28 }
 0x204   : > { %2680 = vmatpush3.bf16.msra.mxu1 %v2679_v33 }
 0x205   : > { %2714 = vmatprep.subr.bf16.mxu1 %v2713_v34 }
 0x207   : > { %1668 = vmatmul.mubr.f32.vlgmr.msra.gmra.mrb[6].mxu1 %v1599_v41 }
 0x208   : > { %2716 = vmatpush3.bf16.msra.mxu1 %v2715_v40  ;;  %1883 = vmatprep.mubr.f32.mxu1 %v1816_v45 }
 0x209   : > { %2718 = vmatprep.subr.bf16.mxu1 %v2717_v42 }
 0x20c   : > { %2720 = vmatpush3.bf16.msra.mxu1 %v2719_v48 }
 0x20d   : > { %2722 = vmatprep.subr.bf16.mxu1 %v2721_v49 }
 0x210   : > { %2724 = vmatpush3.bf16.msra.mxu1 %v2723_v53 }
 0x211   : > { %2726 = vmatprep.subr.bf16.mxu1 %v2725_v54 }
 0x214   : > { %2728 = vmatpush3.bf16.msra.mxu1 %v2727_v59 }
 0x215   : > { %2730 = vmatprep.subr.bf16.mxu1 %v2729_v60 }
 0x218   : > { %2732 = vmatpush3.bf16.msra.mxu1 %v2731_v2 }
 0x219   : > { %2734 = vmatprep.subr.bf16.mxu1 %v2733_v3 }
 0x21c   : > { %2736 = vmatpush3.bf16.msra.mxu1 %v2735_v8 }
 0x21d   : > { %2738 = vmatprep.subr.bf16.mxu1 %v2737_v9 }
 0x220   : > { %2740 = vmatpush3.bf16.msra.mxu1 %v2739_v14 }
 0x221   : > { %2742 = vmatprep.subr.bf16.mxu1 %v2741_v15 }
 0x224   : > { %2744 = vmatpush3.bf16.msra.mxu1 %v2743_v18 }
 0x227   : > { %1884 = vmatmul.mubr.f32.vlgmr.msra.gmra.mrb[8].mxu1 %v1815_v19 }
 0x27a   : > { %v2241_v20 = vpop.f32.mrb[0].mxu1 }
 0x27b   : > { %v2242_v21 = vpop.f32.mrb[1].mxu1 }
 0x27c   : > { %v2243_v22 = vadd.f32 %v2242_v21, %v2241_v20 }
 0x27d   : > { %v2311_v23 = vpop.f32.mrb[2].mxu0 }
 0x27e   : > { %v2312_v24 = vpop.f32.mrb[3].mxu0  ;;  %v1131_v29 = vadd.f32 %v2243_v22, %v226_v26 }
 0x27f   : > { %v2313_v25 = vadd.f32 %v2312_v24, %v2311_v23 }
 0x29a   : > { %v2276_v27 = vpop.f32.mrb[2].mxu1 }
 0x29b   : > { %v2277_v28 = vpop.f32.mrb[3].mxu1 }
 0x29c   : > { %v2278_v30 = vadd.f32 %v2277_v28, %v2276_v27 }
 0x29d   : > { %v2381_v31 = vpop.f32.mrb[4].mxu0 }
 0x29e   : > { %v1241_v32 = vadd.f32 %v2278_v30, %v1131_v29  ;;  %v2382_v33 = vpop.f32.mrb[5].mxu0 }
 0x29f   : > { %v2383_v39 = vadd.f32 %v2382_v33, %v2381_v31 }
 0x2a0   : > { %v1349_v34 = vadd.f32 %v2313_v25, %v1241_v32 }
 0x2ba   : > { %v2346_v35 = vpop.f32.mrb[4].mxu1 }
 0x2bb   : > { %v2347_v36 = vpop.f32.mrb[5].mxu1 }
 0x2bc   : > { %v2348_v37 = vadd.f32 %v2347_v36, %v2346_v35 }
 0x2bd   : > { %v2451_v38 = vpop.f32.mrb[6].mxu0 }
 0x2be   : > { %v1457_v40 = vadd.f32 %v2348_v37, %v1349_v34  ;;  %v2452_v41 = vpop.f32.mrb[7].mxu0 }
 0x2bf   : > { %v2453_v42 = vadd.f32 %v2452_v41, %v2451_v38 }
 0x2c0   : > { %v1565_v43 = vadd.f32 %v2383_v39, %v1457_v40 }
 0x2da   : > { %v2416_v44 = vpop.f32.mrb[6].mxu1 }
 0x2db   : > { %v2417_v45 = vpop.f32.mrb[7].mxu1 }
 0x2dc   : > { %v2418_v46 = vadd.f32 %v2417_v45, %v2416_v44 }
 0x2de   : > { %v1673_v47 = vadd.f32 %v2418_v46, %v1565_v43 }
 0x2e0   : > { %v1781_v48 = vadd.f32 %v2453_v42, %v1673_v47 }
 0x2fa   : > { %v2486_v49 = vpop.f32.mrb[8].mxu1 }
 0x2fb   : > { %v2487_v50 = vpop.f32.mrb[9].mxu1 }
 0x2fc   : > { %v2488_v0 = vadd.f32 %v2487_v50, %v2486_v49 }
 0x2fe   : > { %v1889_v51 = vadd.f32 %v2488_v0, %v1781_v48 }
 0x300   : > { %v1890_v52 = vmax.f32 %v1889_v51, 0.0 }
 0x302   : > { %1891 = vst [vmem:[%s216_s10] sm:$0x1] %v1890_v52 }
 0x303   : > { %2827 = shalt.err (!%p2824_p3)
}
 0x304   : > { %s2828_s25 = scalar_lea.hbm %s3816_s14, 16  ;;  %s2832_s6 = scalar_lea.hbm %s3863_s5, 32 }
 0x305   : > { %p2829_p4 = scmp.ne.s32.totalorder %s3816_s14, %s2828_s25  ;;  %p2833_p9 = scmp.lt.u32.totalorder %s3816_s14, %s3863_s5 }
 0x306   : > { %p2834_p10 = scmp.lt.u32.totalorder %s2832_s6, %s2828_s25  ;;  %p2836_p12 = scmp.lt.u32.totalorder %s2828_s25, %s3816_s14 }
 0x307   : > { %p2830_p7 = pnand %p2829_p4, %p2957_p5 }
 0x308   : > { %p2835_p11 = por %p2834_p10, %p2833_p9 }
 0x309   : > { %p2831_p8 = pneg %p2830_p7 }
 0x30a   : > { %p2837_p13 = por %p2836_p12, %p2835_p11 }
 0x30c   : > { %p2838_p0 = pnand %p2837_p13, %p2831_p8 }
 0x30e   : > { %2841 = shalt.err (!%p2838_p0)
}
 0x30f   : > { %2764 = dma.vmem_to_hbm [thread:$0]  (%p2957_p5), %s3818_s11, 16, %s3816_s14, %s1893_s15  }
 0x310 PF: > { %p2770_p1 = scmp.ge.s32.totalorder %s2876_s21, 2  ;;  %s1917_s9 = sand.u32 1, %s2864_s18  }
 0x311   : > { %s1918_s10 = scalar_lea.sflag [#allocation3], %s1917_s9 }
 0x312   : > { %p2767_p2 = pnand %p2770_p1, %p2961_p6 }
 0x314   : > { %2859 = dma.done.wait (!%p2767_p2), %s1918_s10, 16  }
 0x315   : > { %2861 = vsyncadd (!%p2767_p2), %s1918_s10, 4294967280  ;;  %p15_p3 = scmp.ge.s32.totalorder %s2944_s24, 4   ;;  %s3866_s18 = smov %s2868_s19 }
 0x316   : > { %s3867_s19 = smov %s2872_s20  ;;  %s3868_s20 = smov %s2955_s27 }
 0x317   : > { %s3869_s21 = smov %s2944_s24  ;;  %17 = sbr.rel (!%p15_p3) target bundleno = 3 (0x3), region = 90 }
 0x31e   :  { %1922 = vsyncpa [#allocation3], 1 }
 0x31f   :  { %1924 = vsyncpa [#allocation3 + $0x1], 1 }

</bundles_post_ra>
